<compile_context>
chip_gen: v5e
topology: v5e:2x2
jax: 0.10.0
libtpu: 0.0.40
codegen_flags: <defaults>
</compile_context>

<pallas_src>
import functools
import math

import jax
import jax.numpy as jnp
from jax.experimental import pallas as pl
from jax.experimental.pallas import tpu as pltpu

VMEM_LIMIT_BYTES = 32 * 1024 * 1024   # explicit; safe on v5e/v6e (128 MiB) and v7x (64 MiB)
LN_EPS = 1e-6                         # reference model uses nn.LayerNorm(d_model, eps=1e-6)


def _round_up(x, m):
    return (x + m - 1) // m * m


def _pick_tile(dim, cap, quantum):
    """Largest tile <= cap that evenly divides `dim`; full extent if dim <= cap."""
    if dim <= cap:
        return dim
    t = (cap // quantum) * quantum
    while t > quantum and dim % t:
        t -= quantum
    return t if dim % t == 0 else dim


# ---------------------------------------------------------------------------
# Fused, tiled matmul: out = epilogue(x @ w [+ bias] [ReLU] [+res -> LayerNorm])
# ---------------------------------------------------------------------------

def _fused_matmul_kernel(*refs, has_bias, has_ln, relu, transpose_rhs,
                         ln_inv_d, eps):
    idx = 0
    x_ref = refs[idx]; idx += 1
    w_ref = refs[idx]; idx += 1
    b_ref = None
    res_ref = g_ref = beta_ref = None
    if has_bias:
        b_ref = refs[idx]; idx += 1
    if has_ln:
        res_ref, g_ref, beta_ref = refs[idx], refs[idx + 1], refs[idx + 2]
        idx += 3
    o_ref = refs[idx]
    acc_ref = refs[idx + 1]

    k_idx = pl.program_id(2)

    @pl.when(k_idx == 0)
    def _init():
        acc_ref[...] = jnp.zeros_like(acc_ref)

    # bf16 into the MXU, fp32 accumulation.
    x = x_ref[...].astype(jnp.bfloat16)
    w = w_ref[...].astype(jnp.bfloat16)
    if transpose_rhs:
        acc_ref[...] += jax.lax.dot_general(
            x, w, (((1,), (1,)), ((), ())), preferred_element_type=jnp.float32)
    else:
        acc_ref[...] += jnp.dot(x, w, preferred_element_type=jnp.float32)

    @pl.when(k_idx == pl.num_programs(2) - 1)
    def _epilogue():
        acc = acc_ref[...]
        if has_bias:
            acc = acc + b_ref[...]
        if relu:
            acc = jnp.maximum(acc, 0.0)
        if has_ln:
            acc = acc + res_ref[...]
            # padded feature columns are exactly zero -> sums over the padded
            # width equal sums over the true width; divide by the true dim.
            mean = jnp.sum(acc, axis=-1, keepdims=True) * ln_inv_d
            ex2 = jnp.sum(acc * acc, axis=-1, keepdims=True) * ln_inv_d
            var = ex2 - mean * mean
            acc = (acc - mean) * jax.lax.rsqrt(var + eps)
            acc = acc * g_ref[...] + beta_ref[...]
        o_ref[...] = acc.astype(o_ref.dtype)


def fused_matmul(x, w, bias=None, residual=None, ln_gamma=None, ln_beta=None,
                 ln_dim=None, relu=False, transpose_rhs=False,
                 out_dtype=jnp.float32, tm_cap=256, tn_cap=256, tk_cap=512):
    M, K = x.shape
    if transpose_rhs:
        N, K2 = w.shape
    else:
        K2, N = w.shape
    assert K == K2
    has_bias = bias is not None
    has_ln = ln_gamma is not None
    if has_ln:
        assert ln_dim is not None and ln_beta is not None and residual is not None

    tm = _pick_tile(M, tm_cap, 8)
    tk = _pick_tile(K, tk_cap, 128)
    tn = N if has_ln else _pick_tile(N, tn_cap, 128)  # LN needs the full feature dim
    grid = (M // tm, N // tn, K // tk)

    inputs = [x, w]
    in_specs = [pl.BlockSpec((tm, tk), lambda i, j, k: (i, k))]
    if transpose_rhs:
        in_specs.append(pl.BlockSpec((tn, tk), lambda i, j, k: (j, k)))
    else:
        in_specs.append(pl.BlockSpec((tk, tn), lambda i, j, k: (k, j)))
    if has_bias:
        inputs.append(jnp.asarray(bias, jnp.float32).reshape(1, N))
        in_specs.append(pl.BlockSpec((1, tn), lambda i, j, k: (0, j)))
    if has_ln:
        inputs.append(residual.astype(jnp.float32))
        in_specs.append(pl.BlockSpec((tm, tn), lambda i, j, k: (i, j)))
        inputs.append(jnp.asarray(ln_gamma, jnp.float32).reshape(1, N))
        in_specs.append(pl.BlockSpec((1, tn), lambda i, j, k: (0, j)))
        inputs.append(jnp.asarray(ln_beta, jnp.float32).reshape(1, N))
        in_specs.append(pl.BlockSpec((1, tn), lambda i, j, k: (0, j)))

    kernel = functools.partial(
        _fused_matmul_kernel, has_bias=has_bias, has_ln=has_ln, relu=relu,
        transpose_rhs=transpose_rhs,
        ln_inv_d=(1.0 / float(ln_dim)) if has_ln else 1.0, eps=LN_EPS)

    return pl.pallas_call(
        kernel,
        out_shape=jax.ShapeDtypeStruct((M, N), out_dtype),
        grid=grid,
        in_specs=in_specs,
        out_specs=pl.BlockSpec((tm, tn), lambda i, j, k: (i, j)),
        scratch_shapes=[pltpu.VMEM((tm, tn), jnp.float32)],
        compiler_params=pltpu.CompilerParams(
            dimension_semantics=("parallel", "parallel", "arbitrary"),
            vmem_limit_bytes=VMEM_LIMIT_BYTES),
    )(*inputs)


# ---------------------------------------------------------------------------
# Multi-head scaled-dot-product attention: all heads per grid step (grid over B)
# ---------------------------------------------------------------------------

def _mha_kernel(q_ref, k_ref, v_ref, m_ref, o_ref, *, n_heads, dkp, dvp, scale):
    # additive mask built in-kernel from the int32 keep-mask
    neg = jnp.where(m_ref[0] > 0, 0.0, -1e9).astype(jnp.float32)   # (Lq, Lk)
    q = q_ref[0]                                                    # (Lq, H*dkp)
    k = k_ref[0]                                                    # (Lk, H*dkp)
    v = v_ref[0]                                                    # (Lk, H*dvp)
    outs = []
    for h in range(n_heads):
        qh = q[:, h * dkp:(h + 1) * dkp]
        kh = k[:, h * dkp:(h + 1) * dkp]
        vh = v[:, h * dvp:(h + 1) * dvp]
        s = jax.lax.dot_general(qh, kh, (((1,), (1,)), ((), ())),
                                preferred_element_type=jnp.float32)
        s = s * scale + neg
        s = s - jnp.max(s, axis=-1, keepdims=True)
        p = jnp.exp(s)
        p = p * pl.reciprocal(jnp.sum(p, axis=-1, keepdims=True), approx=True)
        outs.append(jnp.dot(p, vh, preferred_element_type=jnp.float32))
    o_ref[0] = jnp.concatenate(outs, axis=-1).astype(o_ref.dtype)   # lane-dense store


def sdp_attention(q_arr, q_blk, k_arr, k_blk, v_arr, v_blk, mask_i32, cfg):
    """q/k/v are packed (B, L, n*H*dkp) arrays; *_blk selects the column block."""
    B, Lq, _ = q_arr.shape
    Lk = k_arr.shape[1]
    H, dkp, dvp = cfg['n_heads'], cfg['dkp'], cfg['dvp']
    hd = H * dkp
    scale = 1.0 / math.sqrt(cfg['dk'])
    kernel = functools.partial(_mha_kernel, n_heads=H, dkp=dkp, dvp=dvp, scale=scale)
    return pl.pallas_call(
        kernel,
        out_shape=jax.ShapeDtypeStruct((B, Lq, H * dvp), jnp.float32),
        grid=(B,),
        in_specs=[
            pl.BlockSpec((1, Lq, hd), lambda b, blk=q_blk: (b, 0, blk)),
            pl.BlockSpec((1, Lk, hd), lambda b, blk=k_blk: (b, 0, blk)),
            pl.BlockSpec((1, Lk, H * dvp), lambda b, blk=v_blk: (b, 0, blk)),
            pl.BlockSpec((1, Lq, Lk), lambda b: (b, 0, 0)),
        ],
        out_specs=pl.BlockSpec((1, Lq, H * dvp), lambda b: (b, 0, 0)),
        compiler_params=pltpu.CompilerParams(
            dimension_semantics=("parallel",),
            vmem_limit_bytes=VMEM_LIMIT_BYTES),
    )(q_arr, k_arr, v_arr, mask_i32)


# ---------------------------------------------------------------------------
# Fused embedding-scale + positional-encoding + LayerNorm
# ---------------------------------------------------------------------------

def _embed_ln_kernel(x_ref, pos_ref, g_ref, b_ref, o_ref, *, scale, inv_d, eps):
    x = x_ref[0] * scale + pos_ref[...]
    mean = jnp.sum(x, axis=-1, keepdims=True) * inv_d
    ex2 = jnp.sum(x * x, axis=-1, keepdims=True) * inv_d
    var = ex2 - mean * mean
    y = (x - mean) * jax.lax.rsqrt(var + eps)
    o_ref[0] = (y * g_ref[...] + b_ref[...]).astype(o_ref.dtype)


def embed_norm(x_emb, pos_table, gamma, beta, cfg):
    B, L, Dp = x_emb.shape
    scale = float(cfg['embd_dim']) ** 0.5 if cfg['scale_emb'] else 1.0
    kernel = functools.partial(_embed_ln_kernel, scale=scale,
                               inv_d=1.0 / float(cfg['embd_dim']), eps=LN_EPS)
    return pl.pallas_call(
        kernel,
        out_shape=jax.ShapeDtypeStruct((B, L, Dp), jnp.float32),
        grid=(B,),
        in_specs=[
            pl.BlockSpec((1, L, Dp), lambda b: (b, 0, 0)),
            pl.BlockSpec((L, Dp), lambda b: (0, 0)),
            pl.BlockSpec((1, Dp), lambda b: (0, 0)),
            pl.BlockSpec((1, Dp), lambda b: (0, 0)),
        ],
        out_specs=pl.BlockSpec((1, L, Dp), lambda b: (b, 0, 0)),
        compiler_params=pltpu.CompilerParams(
            dimension_semantics=("parallel",),
            vmem_limit_bytes=VMEM_LIMIT_BYTES),
    )(x_emb.astype(jnp.float32), pos_table, gamma, beta)


# ---------------------------------------------------------------------------
# Model blocks
# ---------------------------------------------------------------------------

def multi_head_attention(p, q_in, kv_in, mask_i32, cfg, cross):
    B, Lq, Dp = q_in.shape
    Lk = kv_in.shape[1]
    hd = cfg['n_heads'] * cfg['dkp']
    q2d = q_in.reshape(B * Lq, Dp)
    residual = q2d
    if cross:
        q = fused_matmul(q2d, p['wq']).reshape(B, Lq, hd)
        kv = fused_matmul(kv_in.reshape(B * Lk, Dp), p['wkv']).reshape(B, Lk, 2 * hd)
        q_arr, q_blk, k_arr, k_blk, v_arr, v_blk = q, 0, kv, 0, kv, 1
    else:
        qkv = fused_matmul(q2d, p['wqkv']).reshape(B, Lq, 3 * hd)
        q_arr, q_blk, k_arr, k_blk, v_arr, v_blk = qkv, 0, qkv, 1, qkv, 2
    o = sdp_attention(q_arr, q_blk, k_arr, k_blk, v_arr, v_blk, mask_i32, cfg)
    out = fused_matmul(o.reshape(B * Lq, o.shape[-1]), p['wo'],
                       residual=residual, ln_gamma=p['ln_g'], ln_beta=p['ln_b'],
                       ln_dim=cfg['embd_dim'])          # fused +residual, LayerNorm
    return out.reshape(B, Lq, Dp)


def pos_ffn(p, x, cfg):
    B, L, Dp = x.shape
    x2d = x.reshape(B * L, Dp)
    h = fused_matmul(x2d, p['w1'], bias=p['b1'], relu=True)
    out = fused_matmul(h, p['w2'], bias=p['b2'], residual=x2d,
                       ln_gamma=p['ln_g'], ln_beta=p['ln_b'],
                       ln_dim=cfg['embd_dim'])
    return out.reshape(B, L, Dp)


def encoder_forward(P, src_seq, self_mask, cfg):
    x = jnp.take(P['emb'], src_seq, axis=0)             # (B, Ls, Dp) embedding lookup
    x = embed_norm(x, P['pos_table'], P['enc_ln_g'], P['enc_ln_b'], cfg)
    for lp in P['enc_layers']:
        x = multi_head_attention(lp['slf'], x, x, self_mask, cfg, cross=False)
        x = pos_ffn(lp['ffn'], x, cfg)
    return x


def decoder_forward(P, trg_seq, enc_out, self_mask, cross_mask, cfg):
    x = jnp.take(P['emb'], trg_seq, axis=0)
    x = embed_norm(x, P['pos_table'], P['dec_ln_g'], P['dec_ln_b'], cfg)
    for lp in P['dec_layers']:
        x = multi_head_attention(lp['slf'], x, x, self_mask, cfg, cross=False)
        x = multi_head_attention(lp['enc'], x, enc_out, cross_mask, cfg, cross=True)
        x = pos_ffn(lp['ffn'], x, cfg)
    return x


def transformer_forward(P, inp_seq, out_seq, cfg):
    B, Ls = inp_seq.shape
    Lt = out_seq.shape[1]
    src_keep = (inp_seq != cfg['src_pad_idx'])[:, None, :]          # (B,1,Ls) bool
    trg_keep = (out_seq != cfg['trg_pad_idx'])[:, None, :]          # (B,1,Lt) bool
    tril = jnp.tril(jnp.ones((1, Lt, Lt), dtype=bool))
    # small int32 masks built once per forward; additive mask built in-kernel
    enc_mask = jnp.broadcast_to(src_keep, (B, Ls, Ls)).astype(jnp.int32)
    dec_self_mask = jnp.broadcast_to(trg_keep & tril, (B, Lt, Lt)).astype(jnp.int32)
    dec_cross_mask = jnp.broadcast_to(src_keep, (B, Lt, Ls)).astype(jnp.int32)

    enc_out = encoder_forward(P, inp_seq, enc_mask, cfg)
    dec_out = decoder_forward(P, out_seq, enc_out, dec_self_mask, dec_cross_mask, cfg)

    Dp = dec_out.shape[-1]
    # final Linear(bias=False), weight tied to the shared embedding table.
    # Contract against `emb` in-kernel (transposed) -- no host-side emb.T copy.
    logits = fused_matmul(dec_out.reshape(B * Lt, Dp), P['emb'], transpose_rhs=True)
    logits = logits.reshape(B, Lt, -1)[:, :, :cfg['vocab']]
    if cfg['prj_emb']:
        logits = logits / (cfg['embd_dim'] ** 0.5)
    return logits


# ---------------------------------------------------------------------------
# Parameters (lane-dense zero-padded layout)
# ---------------------------------------------------------------------------

def xavier(key, shape):
    limit = math.sqrt(6.0 / (shape[0] + shape[1]))
    return jax.random.uniform(key, shape, jnp.float32, -limit, limit)


def sinusoid_table(n_position, d):
    pos = jnp.arange(n_position, dtype=jnp.float32)[:, None]
    i = jnp.arange(d)[None, :]
    angle = pos / jnp.power(10000.0, (2 * (i // 2)) / d)
    return jnp.where(i % 2 == 0, jnp.sin(angle), jnp.cos(angle))


def _pad_to(a, shape):
    return jnp.pad(a, [(0, s - d) for d, s in zip(a.shape, shape)])


def make_config():
    cfg = dict(src_pad_idx=0, trg_pad_idx=0, vocab=48, n_layers=2,
               embd_dim=32, n_position=16, n_heads=2, dk=16, dv=16,
               hidden_dim=64, scale_emb=True, prj_emb=False)
    lane = 128
    cfg['embd_dim_p'] = _round_up(cfg['embd_dim'], lane)
    cfg['hidden_dim_p'] = _round_up(cfg['hidden_dim'], lane)
    head_q = lane // cfg['n_heads'] if lane % cfg['n_heads'] == 0 else lane
    cfg['dkp'] = _round_up(cfg['dk'], head_q)
    cfg['dvp'] = _round_up(cfg['dv'], head_q)
    assert cfg['dkp'] == cfg['dvp']
    cfg['vocab_p'] = _round_up(cfg['vocab'], lane)
    return cfg


def init_params(key, cfg):
    D, Dp = cfg['embd_dim'], cfg['embd_dim_p']
    H = cfg['n_heads']
    dk, dv, dkp, dvp = cfg['dk'], cfg['dv'], cfg['dkp'], cfg['dvp']
    hid, hidp = cfg['hidden_dim'], cfg['hidden_dim_p']
    V, Vp = cfg['vocab'], cfg['vocab_p']
    keys = iter(jax.random.split(key, 256))
    bf16 = jnp.bfloat16

    def pad_head_cols(w, d_true, d_pad):             # (K, H*d_true) -> (K, H*d_pad)
        kdim = w.shape[0]
        w = w.reshape(kdim, H, d_true)
        return jnp.pad(w, ((0, 0), (0, 0), (0, d_pad - d_true))).reshape(kdim, H * d_pad)

    def pad_head_rows(w, d_true, d_pad):             # (H*d_true, N) -> (H*d_pad, N)
        ndim = w.shape[1]
        w = w.reshape(H, d_true, ndim)
        return jnp.pad(w, ((0, 0), (0, d_pad - d_true), (0, 0))).reshape(H * d_pad, ndim)

    def ln_pair():
        return (_pad_to(jnp.ones((1, D), jnp.float32), (1, Dp)),
                jnp.zeros((1, Dp), jnp.float32))

    def attn_params(cross):
        wq = _pad_to(pad_head_cols(xavier(next(keys), (D, H * dk)), dk, dkp), (Dp, H * dkp))
        wk = _pad_to(pad_head_cols(xavier(next(keys), (D, H * dk)), dk, dkp), (Dp, H * dkp))
        wv = _pad_to(pad_head_cols(xavier(next(keys), (D, H * dv)), dv, dvp), (Dp, H * dvp))
        wo = _pad_to(pad_head_rows(xavier(next(keys), (H * dv, D)), dv, dvp), (H * dvp, Dp))
        g, b = ln_pair()
        p = dict(wo=wo.astype(bf16), ln_g=g, ln_b=b)
        if cross:
            p['wq'] = wq.astype(bf16)
            p['wkv'] = jnp.concatenate([wk, wv], axis=1).astype(bf16)
        else:
            p['wqkv'] = jnp.concatenate([wq, wk, wv], axis=1).astype(bf16)
        return p

    def ffn_params():
        g, b = ln_pair()
        return dict(
            w1=_pad_to(xavier(next(keys), (D, hid)), (Dp, hidp)).astype(bf16),
            b1=jnp.zeros((1, hidp), jnp.float32),
            w2=_pad_to(xavier(next(keys), (hid, D)), (hidp, Dp)).astype(bf16),
            b2=jnp.zeros((1, Dp), jnp.float32),
            ln_g=g, ln_b=b)

    enc_g, enc_b = ln_pair()
    dec_g, dec_b = ln_pair()
    P = dict(
        emb=_pad_to(xavier(next(keys), (V, D)), (Vp, Dp)),   # shared src/trg/output embedding
        pos_table=_pad_to(sinusoid_table(cfg['n_position'], D), (cfg['n_position'], Dp)),
        enc_ln_g=enc_g, enc_ln_b=enc_b,
        dec_ln_g=dec_g, dec_ln_b=dec_b,
        enc_layers=[dict(slf=attn_params(False), ffn=ffn_params())
                    for _ in range(cfg['n_layers'])],
        dec_layers=[dict(slf=attn_params(False), enc=attn_params(True), ffn=ffn_params())
                    for _ in range(cfg['n_layers'])],
    )
    return P


# ---------------------------------------------------------------------------
# main
# ---------------------------------------------------------------------------

if __name__ == "__main__":
    cfg = make_config()
    B, Ls, Lt = 2, 8, 8

    key = jax.random.PRNGKey(0)
    kp, k1, k2 = jax.random.split(key, 3)
    params = init_params(kp, cfg)

    inp_seq = jax.random.randint(k1, (B, Ls), 1, cfg['vocab']).astype(jnp.int32)
    out_seq = jax.random.randint(k2, (B, Lt), 1, cfg['vocab']).astype(jnp.int32)
    # put some padding at the tail so the pad masks are exercised
    inp_seq = inp_seq.at[:, -2:].set(cfg['src_pad_idx'])
    out_seq = out_seq.at[:, -1:].set(cfg['trg_pad_idx'])

    fwd = jax.jit(functools.partial(transformer_forward, cfg=cfg))
    logits = jax.block_until_ready(fwd(params, inp_seq, out_seq))

    assert logits.shape == (B, Lt, cfg['vocab'])
    assert bool(jnp.all(jnp.isfinite(logits)))
    print("KERNEL_OK")
</pallas_src>

<mosaic_0001>
module attributes {stable_mosaic.version = 11 : i64} {
  func.func @_embed_ln_kernel(%arg0: i32, %arg1: memref<1x8x128xf32, #tpu.memory_space<vmem>>, %arg2: memref<8x128xf32, #tpu.memory_space<vmem>>, %arg3: memref<1x128xf32, #tpu.memory_space<vmem>>, %arg4: memref<1x128xf32, #tpu.memory_space<vmem>>, %arg5: memref<1x8x128xf32, #tpu.memory_space<vmem>>) attributes {dimension_semantics = [#tpu.dimension_semantics<parallel>], iteration_bounds = array<i64: 2>, scalar_prefetch = 0 : i64, scratch_operands = 0 : i64, tpu.core_type = #tpu.core_type<tc>, window_params = [{transform_indices = @transform_0, window_bounds = array<i64: 1, 8, 128>}, {transform_indices = @transform_1, window_bounds = array<i64: 8, 128>}, {pipeline_mode = #tpu.pipeline_mode<synchronous>, transform_indices = @transform_2, window_bounds = array<i64: 1, 128>}, {pipeline_mode = #tpu.pipeline_mode<synchronous>, transform_indices = @transform_3, window_bounds = array<i64: 1, 128>}, {transform_indices = @transform_4, window_bounds = array<i64: 1, 8, 128>}]} {
    %c0 = arith.constant 0 : index
    %c0_0 = arith.constant 0 : index
    %c0_1 = arith.constant 0 : index
    %0 = vector.load %arg1[%c0, %c0_0, %c0_1] : memref<1x8x128xf32, #tpu.memory_space<vmem>>, vector<1x8x128xf32>
    %1 = vector.shape_cast %0 : vector<1x8x128xf32> to vector<8x128xf32>
    %cst = arith.constant 5.65685415 : f32
    %2 = vector.broadcast %cst : f32 to vector<8x128xf32>
    %3 = arith.mulf %1, %2 : vector<8x128xf32>
    %c0_2 = arith.constant 0 : index
    %c0_3 = arith.constant 0 : index
    %4 = vector.load %arg2[%c0_2, %c0_3] : memref<8x128xf32, #tpu.memory_space<vmem>>, vector<8x128xf32>
    %5 = arith.addf %3, %4 : vector<8x128xf32>
    %cst_4 = arith.constant dense<0.000000e+00> : vector<8xf32>
    %6 = vector.multi_reduction <add>, %5, %cst_4 [1] : vector<8x128xf32> to vector<8xf32>
    %7 = vector.shape_cast %6 : vector<8xf32> to vector<8x1xf32>
    %cst_5 = arith.constant 3.125000e-02 : f32
    %8 = vector.broadcast %cst_5 : f32 to vector<8x1xf32>
    %9 = arith.mulf %7, %8 : vector<8x1xf32>
    %10 = arith.mulf %5, %5 : vector<8x128xf32>
    %cst_6 = arith.constant dense<0.000000e+00> : vector<8xf32>
    %11 = vector.multi_reduction <add>, %10, %cst_6 [1] : vector<8x128xf32> to vector<8xf32>
    %12 = vector.shape_cast %11 : vector<8xf32> to vector<8x1xf32>
    %cst_7 = arith.constant 3.125000e-02 : f32
    %13 = vector.broadcast %cst_7 : f32 to vector<8x1xf32>
    %14 = arith.mulf %12, %13 : vector<8x1xf32>
    %15 = arith.mulf %9, %9 : vector<8x1xf32>
    %16 = arith.subf %14, %15 : vector<8x1xf32>
    %17 = vector.broadcast %9 : vector<8x1xf32> to vector<8x128xf32>
    %18 = arith.subf %5, %17 : vector<8x128xf32>
    %cst_8 = arith.constant 9.99999997E-7 : f32
    %19 = vector.broadcast %cst_8 : f32 to vector<8x1xf32>
    %20 = arith.addf %16, %19 : vector<8x1xf32>
    %21 = math.rsqrt %20 : vector<8x1xf32>
    %22 = vector.broadcast %21 : vector<8x1xf32> to vector<8x128xf32>
    %23 = arith.mulf %18, %22 : vector<8x128xf32>
    %c0_9 = arith.constant 0 : index
    %c0_10 = arith.constant 0 : index
    %24 = vector.load %arg3[%c0_9, %c0_10] : memref<1x128xf32, #tpu.memory_space<vmem>>, vector<1x128xf32>
    %25 = vector.broadcast %24 : vector<1x128xf32> to vector<8x128xf32>
    %26 = arith.mulf %23, %25 : vector<8x128xf32>
    %c0_11 = arith.constant 0 : index
    %c0_12 = arith.constant 0 : index
    %27 = vector.load %arg4[%c0_11, %c0_12] : memref<1x128xf32, #tpu.memory_space<vmem>>, vector<1x128xf32>
    %28 = vector.broadcast %27 : vector<1x128xf32> to vector<8x128xf32>
    %29 = arith.addf %26, %28 : vector<8x128xf32>
    %c0_13 = arith.constant 0 : index
    %c0_14 = arith.constant 0 : index
    %c0_15 = arith.constant 0 : index
    %30 = vector.load %arg5[%c0_13, %c0_14, %c0_15] : memref<1x8x128xf32, #tpu.memory_space<vmem>>, vector<1x8x128xf32>
    %31 = vector.shape_cast %30 : vector<1x8x128xf32> to vector<8x128xf32>
    %32 = vector.shape_cast %29 : vector<8x128xf32> to vector<1x8x128xf32>
    tpu.vector_store %arg5[%c0_13, %c0_14, %c0_15], %32 {strides = array<i32>} : memref<1x8x128xf32, #tpu.memory_space<vmem>>, vector<1x8x128xf32>,
    return
  }
  func.func @transform_0(%arg0: i32) -> (i32, i32, i32) {
    %c0_i32 = arith.constant 0 : i32
    %c0_i32_0 = arith.constant 0 : i32
    %c0_i32_1 = arith.constant 0 : i32
    return %arg0, %c0_i32, %c0_i32_0 : i32, i32, i32
  }
  func.func @transform_1(%arg0: i32) -> (i32, i32) {
    %c0_i32 = arith.constant 0 : i32
    %c0_i32_0 = arith.constant 0 : i32
    %c0_i32_1 = arith.constant 0 : i32
    return %c0_i32, %c0_i32_0 : i32, i32
  }
  func.func @transform_2(%arg0: i32) -> (i32, i32) {
    %c0_i32 = arith.constant 0 : i32
    %c0_i32_0 = arith.constant 0 : i32
    %c0_i32_1 = arith.constant 0 : i32
    return %c0_i32, %c0_i32_0 : i32, i32
  }
  func.func @transform_3(%arg0: i32) -> (i32, i32) {
    %c0_i32 = arith.constant 0 : i32
    %c0_i32_0 = arith.constant 0 : i32
    %c0_i32_1 = arith.constant 0 : i32
    return %c0_i32, %c0_i32_0 : i32, i32
  }
  func.func @transform_4(%arg0: i32) -> (i32, i32, i32) {
    %c0_i32 = arith.constant 0 : i32
    %c0_i32_0 = arith.constant 0 : i32
    %c0_i32_1 = arith.constant 0 : i32
    return %arg0, %c0_i32, %c0_i32_0 : i32, i32, i32
  }
}

module attributes {stable_mosaic.version = 11 : i64} {
  func.func @_fused_matmul_kernel(%arg0: i32, %arg1: i32, %arg2: i32, %arg3: memref<16x128xf32, #tpu.memory_space<vmem>>, %arg4: memref<128x128xbf16, #tpu.memory_space<vmem>>, %arg5: memref<16x128xf32, #tpu.memory_space<vmem>>, %arg6: memref<16x128xf32, #tpu.memory_space<vmem>>) attributes {dimension_semantics = [#tpu.dimension_semantics<parallel>, #tpu.dimension_semantics<parallel>, #tpu.dimension_semantics<arbitrary>], iteration_bounds = array<i64: 1, 3, 1>, scalar_prefetch = 0 : i64, scratch_operands = 1 : i64, tpu.core_type = #tpu.core_type<tc>, window_params = [{transform_indices = @transform_0, window_bounds = array<i64: 16, 128>}, {transform_indices = @transform_1, window_bounds = array<i64: 128, 128>}, {transform_indices = @transform_2, window_bounds = array<i64: 16, 128>}]} {
    %c0_i32 = arith.constant 0 : i32
    %0 = arith.cmpi eq, %arg2, %c0_i32 : i32
    %1 = arith.extui %0 : i1 to i32
    %c0_i32_0 = arith.constant 0 : i32
    %2 = arith.cmpi ne, %1, %c0_i32_0 : i32
    scf.if %2 {
      %cst_10 = arith.constant 0.000000e+00 : f32
      %13 = vector.broadcast %cst_10 : f32 to vector<16x128xf32>
      %c0_11 = arith.constant 0 : index
      %c0_12 = arith.constant 0 : index
      %14 = vector.load %arg6[%c0_11, %c0_12] : memref<16x128xf32, #tpu.memory_space<vmem>>, vector<16x128xf32>
      tpu.vector_store %arg6[%c0_11, %c0_12], %13 {strides = array<i32>} : memref<16x128xf32, #tpu.memory_space<vmem>>, vector<16x128xf32>,
    } else {
    }
    %c0 = arith.constant 0 : index
    %c0_1 = arith.constant 0 : index
    %3 = vector.load %arg3[%c0, %c0_1] : memref<16x128xf32, #tpu.memory_space<vmem>>, vector<16x128xf32>
    %4 = arith.truncf %3 : vector<16x128xf32> to vector<16x128xbf16>
    %c0_2 = arith.constant 0 : index
    %c0_3 = arith.constant 0 : index
    %5 = vector.load %arg4[%c0_2, %c0_3] : memref<128x128xbf16, #tpu.memory_space<vmem>>, vector<128x128xbf16>
    %c0_4 = arith.constant 0 : index
    %c0_5 = arith.constant 0 : index
    %6 = vector.load %arg6[%c0_4, %c0_5] : memref<16x128xf32, #tpu.memory_space<vmem>>, vector<16x128xf32>
    %cst = arith.constant dense<0.000000e+00> : vector<16x128xf32>
    %7 = tpu.matmul %4, %5, %cst {dimension_numbers = #tpu.dot_dimension_numbers<[1], [0], [0], [1], [0, 0, 1, 1], [], []>} : vector<16x128xbf16>, vector<128x128xbf16>, vector<16x128xf32> -> vector<16x128xf32>
    %8 = arith.addf %6, %7 : vector<16x128xf32>
    %c0_6 = arith.constant 0 : index
    %c0_7 = arith.constant 0 : index
    %9 = vector.load %arg6[%c0_6, %c0_7] : memref<16x128xf32, #tpu.memory_space<vmem>>, vector<16x128xf32>
    tpu.vector_store %arg6[%c0_6, %c0_7], %8 {strides = array<i32>} : memref<16x128xf32, #tpu.memory_space<vmem>>, vector<16x128xf32>,
    %c0_i32_8 = arith.constant 0 : i32
    %10 = arith.cmpi eq, %arg2, %c0_i32_8 : i32
    %11 = arith.extui %10 : i1 to i32
    %c0_i32_9 = arith.constant 0 : i32
    %12 = arith.cmpi ne, %11, %c0_i32_9 : i32
    scf.if %12 {
      %c0_10 = arith.constant 0 : index
      %c0_11 = arith.constant 0 : index
      %13 = vector.load %arg6[%c0_10, %c0_11] : memref<16x128xf32, #tpu.memory_space<vmem>>, vector<16x128xf32>
      %c0_12 = arith.constant 0 : index
      %c0_13 = arith.constant 0 : index
      %14 = vector.load %arg5[%c0_12, %c0_13] : memref<16x128xf32, #tpu.memory_space<vmem>>, vector<16x128xf32>
      tpu.vector_store %arg5[%c0_12, %c0_13], %13 {strides = array<i32>} : memref<16x128xf32, #tpu.memory_space<vmem>>, vector<16x128xf32>,
    } else {
    }
    return
  }
  func.func @transform_0(%arg0: i32, %arg1: i32, %arg2: i32) -> (i32, i32) {
    %c0_i32 = arith.constant 0 : i32
    return %arg0, %arg2 : i32, i32
  }
  func.func @transform_1(%arg0: i32, %arg1: i32, %arg2: i32) -> (i32, i32) {
    %c0_i32 = arith.constant 0 : i32
    return %arg2, %arg1 : i32, i32
  }
  func.func @transform_2(%arg0: i32, %arg1: i32, %arg2: i32) -> (i32, i32) {
    %c0_i32 = arith.constant 0 : i32
    return %arg0, %arg1 : i32, i32
  }
}

module attributes {stable_mosaic.version = 11 : i64} {
  func.func @_mha_kernel(%arg0: i32, %arg1: memref<1x8x128xf32, #tpu.memory_space<vmem>>, %arg2: memref<1x8x128xf32, #tpu.memory_space<vmem>>, %arg3: memref<1x8x128xf32, #tpu.memory_space<vmem>>, %arg4: memref<1x8x8xi32, #tpu.memory_space<vmem>>, %arg5: memref<1x8x128xf32, #tpu.memory_space<vmem>>) attributes {dimension_semantics = [#tpu.dimension_semantics<parallel>], iteration_bounds = array<i64: 2>, scalar_prefetch = 0 : i64, scratch_operands = 0 : i64, tpu.core_type = #tpu.core_type<tc>, window_params = [{transform_indices = @transform_0, window_bounds = array<i64: 1, 8, 128>}, {transform_indices = @transform_1, window_bounds = array<i64: 1, 8, 128>}, {transform_indices = @transform_2, window_bounds = array<i64: 1, 8, 128>}, {transform_indices = @transform_3, window_bounds = array<i64: 1, 8, 8>}, {transform_indices = @transform_4, window_bounds = array<i64: 1, 8, 128>}]} {
    %c0 = arith.constant 0 : index
    %c0_0 = arith.constant 0 : index
    %c0_1 = arith.constant 0 : index
    %0 = vector.load %arg4[%c0, %c0_0, %c0_1] : memref<1x8x8xi32, #tpu.memory_space<vmem>>, vector<1x8x8xi32>
    %1 = vector.shape_cast %0 : vector<1x8x8xi32> to vector<8x8xi32>
    %c0_i32 = arith.constant 0 : i32
    %2 = vector.broadcast %c0_i32 : i32 to vector<8x8xi32>
    %3 = arith.cmpi sgt, %1, %2 : vector<8x8xi32>
    %cst = arith.constant 0.000000e+00 : f32
    %cst_2 = arith.constant -1.000000e+09 : f32
    %4 = vector.broadcast %cst : f32 to vector<8x8xf32>
    %5 = vector.broadcast %cst_2 : f32 to vector<8x8xf32>
    %6 = arith.select %3, %4, %5 : vector<8x8xi1>, vector<8x8xf32>
    %c0_3 = arith.constant 0 : index
    %c0_4 = arith.constant 0 : index
    %c0_5 = arith.constant 0 : index
    %7 = vector.load %arg1[%c0_3, %c0_4, %c0_5] : memref<1x8x128xf32, #tpu.memory_space<vmem>>, vector<1x8x128xf32>
    %8 = vector.shape_cast %7 : vector<1x8x128xf32> to vector<8x128xf32>
    %c0_6 = arith.constant 0 : index
    %c0_7 = arith.constant 0 : index
    %c0_8 = arith.constant 0 : index
    %9 = vector.load %arg2[%c0_6, %c0_7, %c0_8] : memref<1x8x128xf32, #tpu.memory_space<vmem>>, vector<1x8x128xf32>
    %10 = vector.shape_cast %9 : vector<1x8x128xf32> to vector<8x128xf32>
    %c0_9 = arith.constant 0 : index
    %c0_10 = arith.constant 0 : index
    %c0_11 = arith.constant 0 : index
    %11 = vector.load %arg3[%c0_9, %c0_10, %c0_11] : memref<1x8x128xf32, #tpu.memory_space<vmem>>, vector<1x8x128xf32>
    %12 = vector.shape_cast %11 : vector<1x8x128xf32> to vector<8x128xf32>
    %13 = vector.extract_strided_slice %8 {offsets = [0, 0], sizes = [8, 64], strides = [1, 1]} : vector<8x128xf32> to vector<8x64xf32>
    %14 = vector.extract_strided_slice %10 {offsets = [0, 0], sizes = [8, 64], strides = [1, 1]} : vector<8x128xf32> to vector<8x64xf32>
    %15 = vector.extract_strided_slice %12 {offsets = [0, 0], sizes = [8, 64], strides = [1, 1]} : vector<8x128xf32> to vector<8x64xf32>
    %cst_12 = arith.constant dense<0.000000e+00> : vector<8x8xf32>
    %16 = tpu.matmul %13, %14, %cst_12 {dimension_numbers = #tpu.dot_dimension_numbers<[1], [1], [0], [0], [0, 0, 1, 0], [], []>} : vector<8x64xf32>, vector<8x64xf32>, vector<8x8xf32> -> vector<8x8xf32>
    %cst_13 = arith.constant 2.500000e-01 : f32
    %17 = vector.broadcast %cst_13 : f32 to vector<8x8xf32>
    %18 = arith.mulf %16, %17 : vector<8x8xf32>
    %19 = arith.addf %18, %6 : vector<8x8xf32>
    %cst_14 = arith.constant dense<0xFF800000> : vector<8xf32>
    %20 = vector.multi_reduction <maximumf>, %19, %cst_14 [1] : vector<8x8xf32> to vector<8xf32>
    %21 = vector.shape_cast %20 : vector<8xf32> to vector<8x1xf32>
    %22 = vector.broadcast %21 : vector<8x1xf32> to vector<8x8xf32>
    %23 = arith.subf %19, %22 : vector<8x8xf32>
    %24 = math.exp %23 : vector<8x8xf32>
    %cst_15 = arith.constant dense<0.000000e+00> : vector<8xf32>
    %25 = vector.multi_reduction <add>, %24, %cst_15 [1] : vector<8x8xf32> to vector<8xf32>
    %26 = vector.shape_cast %25 : vector<8xf32> to vector<8x1xf32>
    %27 = tpu.reciprocal %26 {approx = true} : vector<8x1xf32> -> vector<8x1xf32>
    %28 = vector.broadcast %27 : vector<8x1xf32> to vector<8x8xf32>
    %29 = arith.mulf %24, %28 : vector<8x8xf32>
    %cst_16 = arith.constant dense<0.000000e+00> : vector<8x64xf32>
    %30 = tpu.matmul %29, %15, %cst_16 {dimension_numbers = #tpu.dot_dimension_numbers<[1], [0], [0], [1], [0, 0, 1, 1], [], []>} : vector<8x8xf32>, vector<8x64xf32>, vector<8x64xf32> -> vector<8x64xf32>
    %31 = vector.extract_strided_slice %8 {offsets = [0, 64], sizes = [8, 64], strides = [1, 1]} : vector<8x128xf32> to vector<8x64xf32>
    %32 = vector.extract_strided_slice %10 {offsets = [0, 64], sizes = [8, 64], strides = [1, 1]} : vector<8x128xf32> to vector<8x64xf32>
    %33 = vector.extract_strided_slice %12 {offsets = [0, 64], sizes = [8, 64], strides = [1, 1]} : vector<8x128xf32> to vector<8x64xf32>
    %cst_17 = arith.constant dense<0.000000e+00> : vector<8x8xf32>
    %34 = tpu.matmul %31, %32, %cst_17 {dimension_numbers = #tpu.dot_dimension_numbers<[1], [1], [0], [0], [0, 0, 1, 0], [], []>} : vector<8x64xf32>, vector<8x64xf32>, vector<8x8xf32> -> vector<8x8xf32>
    %cst_18 = arith.constant 2.500000e-01 : f32
    %35 = vector.broadcast %cst_18 : f32 to vector<8x8xf32>
    %36 = arith.mulf %34, %35 : vector<8x8xf32>
    %37 = arith.addf %36, %6 : vector<8x8xf32>
    %cst_19 = arith.constant dense<0xFF800000> : vector<8xf32>
    %38 = vector.multi_reduction <maximumf>, %37, %cst_19 [1] : vector<8x8xf32> to vector<8xf32>
    %39 = vector.shape_cast %38 : vector<8xf32> to vector<8x1xf32>
    %40 = vector.broadcast %39 : vector<8x1xf32> to vector<8x8xf32>
    %41 = arith.subf %37, %40 : vector<8x8xf32>
    %42 = math.exp %41 : vector<8x8xf32>
    %cst_20 = arith.constant dense<0.000000e+00> : vector<8xf32>
    %43 = vector.multi_reduction <add>, %42, %cst_20 [1] : vector<8x8xf32> to vector<8xf32>
    %44 = vector.shape_cast %43 : vector<8xf32> to vector<8x1xf32>
    %45 = tpu.reciprocal %44 {approx = true} : vector<8x1xf32> -> vector<8x1xf32>
    %46 = vector.broadcast %45 : vector<8x1xf32> to vector<8x8xf32>
    %47 = arith.mulf %42, %46 : vector<8x8xf32>
    %cst_21 = arith.constant dense<0.000000e+00> : vector<8x64xf32>
    %48 = tpu.matmul %47, %33, %cst_21 {dimension_numbers = #tpu.dot_dimension_numbers<[1], [0], [0], [1], [0, 0, 1, 1], [], []>} : vector<8x8xf32>, vector<8x64xf32>, vector<8x64xf32> -> vector<8x64xf32>
    %49 = tpu.concatenate %30, %48 in 1 : vector<8x64xf32>, vector<8x64xf32> -> vector<8x128xf32>
    %c0_22 = arith.constant 0 : index
    %c0_23 = arith.constant 0 : index
    %c0_24 = arith.constant 0 : index
    %50 = vector.load %arg5[%c0_22, %c0_23, %c0_24] : memref<1x8x128xf32, #tpu.memory_space<vmem>>, vector<1x8x128xf32>
    %51 = vector.shape_cast %50 : vector<1x8x128xf32> to vector<8x128xf32>
    %52 = vector.shape_cast %49 : vector<8x128xf32> to vector<1x8x128xf32>
    tpu.vector_store %arg5[%c0_22, %c0_23, %c0_24], %52 {strides = array<i32>} : memref<1x8x128xf32, #tpu.memory_space<vmem>>, vector<1x8x128xf32>,
    return
  }
  func.func @transform_0(%arg0: i32) -> (i32, i32, i32) {
    %c0_i32 = arith.constant 0 : i32
    %c0_i32_0 = arith.constant 0 : i32
    %c0_i32_1 = arith.constant 0 : i32
    return %arg0, %c0_i32, %c0_i32_0 : i32, i32, i32
  }
  func.func @transform_1(%arg0: i32) -> (i32, i32, i32) {
    %c0_i32 = arith.constant 0 : i32
    %c1_i32 = arith.constant 1 : i32
    %c0_i32_0 = arith.constant 0 : i32
    return %arg0, %c0_i32, %c1_i32 : i32, i32, i32
  }
  func.func @transform_2(%arg0: i32) -> (i32, i32, i32) {
    %c0_i32 = arith.constant 0 : i32
    %c2_i32 = arith.constant 2 : i32
    %c0_i32_0 = arith.constant 0 : i32
    return %arg0, %c0_i32, %c2_i32 : i32, i32, i32
  }
  func.func @transform_3(%arg0: i32) -> (i32, i32, i32) {
    %c0_i32 = arith.constant 0 : i32
    %c0_i32_0 = arith.constant 0 : i32
    %c0_i32_1 = arith.constant 0 : i32
    return %arg0, %c0_i32, %c0_i32_0 : i32, i32, i32
  }
  func.func @transform_4(%arg0: i32) -> (i32, i32, i32) {
    %c0_i32 = arith.constant 0 : i32
    %c0_i32_0 = arith.constant 0 : i32
    %c0_i32_1 = arith.constant 0 : i32
    return %arg0, %c0_i32, %c0_i32_0 : i32, i32, i32
  }
}

module attributes {stable_mosaic.version = 11 : i64} {
  func.func @_fused_matmul_kernel(%arg0: i32, %arg1: i32, %arg2: i32, %arg3: memref<16x128xf32, #tpu.memory_space<vmem>>, %arg4: memref<128x128xbf16, #tpu.memory_space<vmem>>, %arg5: memref<16x128xf32, #tpu.memory_space<vmem>>, %arg6: memref<1x128xf32, #tpu.memory_space<vmem>>, %arg7: memref<1x128xf32, #tpu.memory_space<vmem>>, %arg8: memref<16x128xf32, #tpu.memory_space<vmem>>, %arg9: memref<16x128xf32, #tpu.memory_space<vmem>>) attributes {dimension_semantics = [#tpu.dimension_semantics<parallel>, #tpu.dimension_semantics<parallel>, #tpu.dimension_semantics<arbitrary>], iteration_bounds = array<i64: 1, 1, 1>, scalar_prefetch = 0 : i64, scratch_operands = 1 : i64, tpu.core_type = #tpu.core_type<tc>, window_params = [{transform_indices = @transform_0, window_bounds = array<i64: 16, 128>}, {transform_indices = @transform_1, window_bounds = array<i64: 128, 128>}, {transform_indices = @transform_2, window_bounds = array<i64: 16, 128>}, {transform_indices = @transform_3, window_bounds = array<i64: 1, 128>}, {transform_indices = @transform_4, window_bounds = array<i64: 1, 128>}, {transform_indices = @transform_5, window_bounds = array<i64: 16, 128>}]} {
    %c0_i32 = arith.constant 0 : i32
    %0 = arith.cmpi eq, %arg2, %c0_i32 : i32
    %1 = arith.extui %0 : i1 to i32
    %c0_i32_0 = arith.constant 0 : i32
    %2 = arith.cmpi ne, %1, %c0_i32_0 : i32
    scf.if %2 {
      %cst_10 = arith.constant 0.000000e+00 : f32
      %13 = vector.broadcast %cst_10 : f32 to vector<16x128xf32>
      %c0_11 = arith.constant 0 : index
      %c0_12 = arith.constant 0 : index
      %14 = vector.load %arg9[%c0_11, %c0_12] : memref<16x128xf32, #tpu.memory_space<vmem>>, vector<16x128xf32>
      tpu.vector_store %arg9[%c0_11, %c0_12], %13 {strides = array<i32>} : memref<16x128xf32, #tpu.memory_space<vmem>>, vector<16x128xf32>,
    } else {
    }
    %c0 = arith.constant 0 : index
    %c0_1 = arith.constant 0 : index
    %3 = vector.load %arg3[%c0, %c0_1] : memref<16x128xf32, #tpu.memory_space<vmem>>, vector<16x128xf32>
    %4 = arith.truncf %3 : vector<16x128xf32> to vector<16x128xbf16>
    %c0_2 = arith.constant 0 : index
    %c0_3 = arith.constant 0 : index
    %5 = vector.load %arg4[%c0_2, %c0_3] : memref<128x128xbf16, #tpu.memory_space<vmem>>, vector<128x128xbf16>
    %c0_4 = arith.constant 0 : index
    %c0_5 = arith.constant 0 : index
    %6 = vector.load %arg9[%c0_4, %c0_5] : memref<16x128xf32, #tpu.memory_space<vmem>>, vector<16x128xf32>
    %cst = arith.constant dense<0.000000e+00> : vector<16x128xf32>
    %7 = tpu.matmul %4, %5, %cst {dimension_numbers = #tpu.dot_dimension_numbers<[1], [0], [0], [1], [0, 0, 1, 1], [], []>} : vector<16x128xbf16>, vector<128x128xbf16>, vector<16x128xf32> -> vector<16x128xf32>
    %8 = arith.addf %6, %7 : vector<16x128xf32>
    %c0_6 = arith.constant 0 : index
    %c0_7 = arith.constant 0 : index
    %9 = vector.load %arg9[%c0_6, %c0_7] : memref<16x128xf32, #tpu.memory_space<vmem>>, vector<16x128xf32>
    tpu.vector_store %arg9[%c0_6, %c0_7], %8 {strides = array<i32>} : memref<16x128xf32, #tpu.memory_space<vmem>>, vector<16x128xf32>,
    %c0_i32_8 = arith.constant 0 : i32
    %10 = arith.cmpi eq, %arg2, %c0_i32_8 : i32
    %11 = arith.extui %10 : i1 to i32
    %c0_i32_9 = arith.constant 0 : i32
    %12 = arith.cmpi ne, %11, %c0_i32_9 : i32
    scf.if %12 {
      %c0_10 = arith.constant 0 : index
      %c0_11 = arith.constant 0 : index
      %13 = vector.load %arg9[%c0_10, %c0_11] : memref<16x128xf32, #tpu.memory_space<vmem>>, vector<16x128xf32>
      %c0_12 = arith.constant 0 : index
      %c0_13 = arith.constant 0 : index
      %14 = vector.load %arg5[%c0_12, %c0_13] : memref<16x128xf32, #tpu.memory_space<vmem>>, vector<16x128xf32>
      %15 = arith.addf %13, %14 : vector<16x128xf32>
      %cst_14 = arith.constant dense<0.000000e+00> : vector<16xf32>
      %16 = vector.multi_reduction <add>, %15, %cst_14 [1] : vector<16x128xf32> to vector<16xf32>
      %17 = vector.shape_cast %16 : vector<16xf32> to vector<16x1xf32>
      %cst_15 = arith.constant 3.125000e-02 : f32
      %18 = vector.broadcast %cst_15 : f32 to vector<16x1xf32>
      %19 = arith.mulf %17, %18 : vector<16x1xf32>
      %20 = arith.mulf %15, %15 : vector<16x128xf32>
      %cst_16 = arith.constant dense<0.000000e+00> : vector<16xf32>
      %21 = vector.multi_reduction <add>, %20, %cst_16 [1] : vector<16x128xf32> to vector<16xf32>
      %22 = vector.shape_cast %21 : vector<16xf32> to vector<16x1xf32>
      %cst_17 = arith.constant 3.125000e-02 : f32
      %23 = vector.broadcast %cst_17 : f32 to vector<16x1xf32>
      %24 = arith.mulf %22, %23 : vector<16x1xf32>
      %25 = arith.mulf %19, %19 : vector<16x1xf32>
      %26 = arith.subf %24, %25 : vector<16x1xf32>
      %27 = vector.broadcast %19 : vector<16x1xf32> to vector<16x128xf32>
      %28 = arith.subf %15, %27 : vector<16x128xf32>
      %cst_18 = arith.constant 9.99999997E-7 : f32
      %29 = vector.broadcast %cst_18 : f32 to vector<16x1xf32>
      %30 = arith.addf %26, %29 : vector<16x1xf32>
      %31 = math.rsqrt %30 : vector<16x1xf32>
      %32 = vector.broadcast %31 : vector<16x1xf32> to vector<16x128xf32>
      %33 = arith.mulf %28, %32 : vector<16x128xf32>
      %c0_19 = arith.constant 0 : index
      %c0_20 = arith.constant 0 : index
      %34 = vector.load %arg6[%c0_19, %c0_20] : memref<1x128xf32, #tpu.memory_space<vmem>>, vector<1x128xf32>
      %35 = vector.broadcast %34 : vector<1x128xf32> to vector<16x128xf32>
      %36 = arith.mulf %33, %35 : vector<16x128xf32>
      %c0_21 = arith.constant 0 : index
      %c0_22 = arith.constant 0 : index
      %37 = vector.load %arg7[%c0_21, %c0_22] : memref<1x128xf32, #tpu.memory_space<vmem>>, vector<1x128xf32>
      %38 = vector.broadcast %37 : vector<1x128xf32> to vector<16x128xf32>
      %39 = arith.addf %36, %38 : vector<16x128xf32>
      %c0_23 = arith.constant 0 : index
      %c0_24 = arith.constant 0 : index
      %40 = vector.load %arg8[%c0_23, %c0_24] : memref<16x128xf32, #tpu.memory_space<vmem>>, vector<16x128xf32>
      tpu.vector_store %arg8[%c0_23, %c0_24], %39 {strides = array<i32>} : memref<16x128xf32, #tpu.memory_space<vmem>>, vector<16x128xf32>,
    } else {
    }
    return
  }
  func.func @transform_0(%arg0: i32, %arg1: i32, %arg2: i32) -> (i32, i32) {
    %c0_i32 = arith.constant 0 : i32
    return %arg0, %arg2 : i32, i32
  }
  func.func @transform_1(%arg0: i32, %arg1: i32, %arg2: i32) -> (i32, i32) {
    %c0_i32 = arith.constant 0 : i32
    return %arg2, %arg1 : i32, i32
  }
  func.func @transform_2(%arg0: i32, %arg1: i32, %arg2: i32) -> (i32, i32) {
    %c0_i32 = arith.constant 0 : i32
    return %arg0, %arg1 : i32, i32
  }
  func.func @transform_3(%arg0: i32, %arg1: i32, %arg2: i32) -> (i32, i32) {
    %c0_i32 = arith.constant 0 : i32
    %c0_i32_0 = arith.constant 0 : i32
    return %c0_i32, %arg1 : i32, i32
  }
  func.func @transform_4(%arg0: i32, %arg1: i32, %arg2: i32) -> (i32, i32) {
    %c0_i32 = arith.constant 0 : i32
    %c0_i32_0 = arith.constant 0 : i32
    return %c0_i32, %arg1 : i32, i32
  }
  func.func @transform_5(%arg0: i32, %arg1: i32, %arg2: i32) -> (i32, i32) {
    %c0_i32 = arith.constant 0 : i32
    return %arg0, %arg1 : i32, i32
  }
}

module attributes {stable_mosaic.version = 11 : i64} {
  func.func @_fused_matmul_kernel(%arg0: i32, %arg1: i32, %arg2: i32, %arg3: memref<16x128xf32, #tpu.memory_space<vmem>>, %arg4: memref<128x128xbf16, #tpu.memory_space<vmem>>, %arg5: memref<16x128xf32, #tpu.memory_space<vmem>>, %arg6: memref<16x128xf32, #tpu.memory_space<vmem>>) attributes {dimension_semantics = [#tpu.dimension_semantics<parallel>, #tpu.dimension_semantics<parallel>, #tpu.dimension_semantics<arbitrary>], iteration_bounds = array<i64: 1, 3, 1>, scalar_prefetch = 0 : i64, scratch_operands = 1 : i64, tpu.core_type = #tpu.core_type<tc>, window_params = [{transform_indices = @transform_0, window_bounds = array<i64: 16, 128>}, {transform_indices = @transform_1, window_bounds = array<i64: 128, 128>}, {transform_indices = @transform_2, window_bounds = array<i64: 16, 128>}]} {
    %c0_i32 = arith.constant 0 : i32
    %0 = arith.cmpi eq, %arg2, %c0_i32 : i32
    %1 = arith.extui %0 : i1 to i32
    %c0_i32_0 = arith.constant 0 : i32
    %2 = arith.cmpi ne, %1, %c0_i32_0 : i32
    scf.if %2 {
      %cst_10 = arith.constant 0.000000e+00 : f32
      %13 = vector.broadcast %cst_10 : f32 to vector<16x128xf32>
      %c0_11 = arith.constant 0 : index
      %c0_12 = arith.constant 0 : index
      %14 = vector.load %arg6[%c0_11, %c0_12] : memref<16x128xf32, #tpu.memory_space<vmem>>, vector<16x128xf32>
      tpu.vector_store %arg6[%c0_11, %c0_12], %13 {strides = array<i32>} : memref<16x128xf32, #tpu.memory_space<vmem>>, vector<16x128xf32>,
    } else {
    }
    %c0 = arith.constant 0 : index
    %c0_1 = arith.constant 0 : index
    %3 = vector.load %arg3[%c0, %c0_1] : memref<16x128xf32, #tpu.memory_space<vmem>>, vector<16x128xf32>
    %4 = arith.truncf %3 : vector<16x128xf32> to vector<16x128xbf16>
    %c0_2 = arith.constant 0 : index
    %c0_3 = arith.constant 0 : index
    %5 = vector.load %arg4[%c0_2, %c0_3] : memref<128x128xbf16, #tpu.memory_space<vmem>>, vector<128x128xbf16>
    %c0_4 = arith.constant 0 : index
    %c0_5 = arith.constant 0 : index
    %6 = vector.load %arg6[%c0_4, %c0_5] : memref<16x128xf32, #tpu.memory_space<vmem>>, vector<16x128xf32>
    %cst = arith.constant dense<0.000000e+00> : vector<16x128xf32>
    %7 = tpu.matmul %4, %5, %cst {dimension_numbers = #tpu.dot_dimension_numbers<[1], [0], [0], [1], [0, 0, 1, 1], [], []>} : vector<16x128xbf16>, vector<128x128xbf16>, vector<16x128xf32> -> vector<16x128xf32>
    %8 = arith.addf %6, %7 : vector<16x128xf32>
    %c0_6 = arith.constant 0 : index
    %c0_7 = arith.constant 0 : index
    %9 = vector.load %arg6[%c0_6, %c0_7] : memref<16x128xf32, #tpu.memory_space<vmem>>, vector<16x128xf32>
    tpu.vector_store %arg6[%c0_6, %c0_7], %8 {strides = array<i32>} : memref<16x128xf32, #tpu.memory_space<vmem>>, vector<16x128xf32>,
    %c0_i32_8 = arith.constant 0 : i32
    %10 = arith.cmpi eq, %arg2, %c0_i32_8 : i32
    %11 = arith.extui %10 : i1 to i32
    %c0_i32_9 = arith.constant 0 : i32
    %12 = arith.cmpi ne, %11, %c0_i32_9 : i32
    scf.if %12 {
      %c0_10 = arith.constant 0 : index
      %c0_11 = arith.constant 0 : index
      %13 = vector.load %arg6[%c0_10, %c0_11] : memref<16x128xf32, #tpu.memory_space<vmem>>, vector<16x128xf32>
      %c0_12 = arith.constant 0 : index
      %c0_13 = arith.constant 0 : index
      %14 = vector.load %arg5[%c0_12, %c0_13] : memref<16x128xf32, #tpu.memory_space<vmem>>, vector<16x128xf32>
      tpu.vector_store %arg5[%c0_12, %c0_13], %13 {strides = array<i32>} : memref<16x128xf32, #tpu.memory_space<vmem>>, vector<16x128xf32>,
    } else {
    }
    return
  }
  func.func @transform_0(%arg0: i32, %arg1: i32, %arg2: i32) -> (i32, i32) {
    %c0_i32 = arith.constant 0 : i32
    return %arg0, %arg2 : i32, i32
  }
  func.func @transform_1(%arg0: i32, %arg1: i32, %arg2: i32) -> (i32, i32) {
    %c0_i32 = arith.constant 0 : i32
    return %arg2, %arg1 : i32, i32
  }
  func.func @transform_2(%arg0: i32, %arg1: i32, %arg2: i32) -> (i32, i32) {
    %c0_i32 = arith.constant 0 : i32
    return %arg0, %arg1 : i32, i32
  }
}

module attributes {stable_mosaic.version = 11 : i64} {
  func.func @_fused_matmul_kernel(%arg0: i32, %arg1: i32, %arg2: i32, %arg3: memref<16x128xf32, #tpu.memory_space<vmem>>, %arg4: memref<128x128xbf16, #tpu.memory_space<vmem>>, %arg5: memref<16x128xf32, #tpu.memory_space<vmem>>, %arg6: memref<16x128xf32, #tpu.memory_space<vmem>>) attributes {dimension_semantics = [#tpu.dimension_semantics<parallel>, #tpu.dimension_semantics<parallel>, #tpu.dimension_semantics<arbitrary>], iteration_bounds = array<i64: 1, 1, 1>, scalar_prefetch = 0 : i64, scratch_operands = 1 : i64, tpu.core_type = #tpu.core_type<tc>, window_params = [{transform_indices = @transform_0, window_bounds = array<i64: 16, 128>}, {transform_indices = @transform_1, window_bounds = array<i64: 128, 128>}, {transform_indices = @transform_2, window_bounds = array<i64: 16, 128>}]} {
    %c0_i32 = arith.constant 0 : i32
    %0 = arith.cmpi eq, %arg2, %c0_i32 : i32
    %1 = arith.extui %0 : i1 to i32
    %c0_i32_0 = arith.constant 0 : i32
    %2 = arith.cmpi ne, %1, %c0_i32_0 : i32
    scf.if %2 {
      %cst_10 = arith.constant 0.000000e+00 : f32
      %13 = vector.broadcast %cst_10 : f32 to vector<16x128xf32>
      %c0_11 = arith.constant 0 : index
      %c0_12 = arith.constant 0 : index
      %14 = vector.load %arg6[%c0_11, %c0_12] : memref<16x128xf32, #tpu.memory_space<vmem>>, vector<16x128xf32>
      tpu.vector_store %arg6[%c0_11, %c0_12], %13 {strides = array<i32>} : memref<16x128xf32, #tpu.memory_space<vmem>>, vector<16x128xf32>,
    } else {
    }
    %c0 = arith.constant 0 : index
    %c0_1 = arith.constant 0 : index
    %3 = vector.load %arg3[%c0, %c0_1] : memref<16x128xf32, #tpu.memory_space<vmem>>, vector<16x128xf32>
    %4 = arith.truncf %3 : vector<16x128xf32> to vector<16x128xbf16>
    %c0_2 = arith.constant 0 : index
    %c0_3 = arith.constant 0 : index
    %5 = vector.load %arg4[%c0_2, %c0_3] : memref<128x128xbf16, #tpu.memory_space<vmem>>, vector<128x128xbf16>
    %c0_4 = arith.constant 0 : index
    %c0_5 = arith.constant 0 : index
    %6 = vector.load %arg6[%c0_4, %c0_5] : memref<16x128xf32, #tpu.memory_space<vmem>>, vector<16x128xf32>
    %cst = arith.constant dense<0.000000e+00> : vector<16x128xf32>
    %7 = tpu.matmul %4, %5, %cst {dimension_numbers = #tpu.dot_dimension_numbers<[1], [0], [0], [1], [0, 0, 1, 1], [], []>} : vector<16x128xbf16>, vector<128x128xbf16>, vector<16x128xf32> -> vector<16x128xf32>
    %8 = arith.addf %6, %7 : vector<16x128xf32>
    %c0_6 = arith.constant 0 : index
    %c0_7 = arith.constant 0 : index
    %9 = vector.load %arg6[%c0_6, %c0_7] : memref<16x128xf32, #tpu.memory_space<vmem>>, vector<16x128xf32>
    tpu.vector_store %arg6[%c0_6, %c0_7], %8 {strides = array<i32>} : memref<16x128xf32, #tpu.memory_space<vmem>>, vector<16x128xf32>,
    %c0_i32_8 = arith.constant 0 : i32
    %10 = arith.cmpi eq, %arg2, %c0_i32_8 : i32
    %11 = arith.extui %10 : i1 to i32
    %c0_i32_9 = arith.constant 0 : i32
    %12 = arith.cmpi ne, %11, %c0_i32_9 : i32
    scf.if %12 {
      %c0_10 = arith.constant 0 : index
      %c0_11 = arith.constant 0 : index
      %13 = vector.load %arg6[%c0_10, %c0_11] : memref<16x128xf32, #tpu.memory_space<vmem>>, vector<16x128xf32>
      %c0_12 = arith.constant 0 : index
      %c0_13 = arith.constant 0 : index
      %14 = vector.load %arg5[%c0_12, %c0_13] : memref<16x128xf32, #tpu.memory_space<vmem>>, vector<16x128xf32>
      tpu.vector_store %arg5[%c0_12, %c0_13], %13 {strides = array<i32>} : memref<16x128xf32, #tpu.memory_space<vmem>>, vector<16x128xf32>,
    } else {
    }
    return
  }
  func.func @transform_0(%arg0: i32, %arg1: i32, %arg2: i32) -> (i32, i32) {
    %c0_i32 = arith.constant 0 : i32
    return %arg0, %arg2 : i32, i32
  }
  func.func @transform_1(%arg0: i32, %arg1: i32, %arg2: i32) -> (i32, i32) {
    %c0_i32 = arith.constant 0 : i32
    return %arg2, %arg1 : i32, i32
  }
  func.func @transform_2(%arg0: i32, %arg1: i32, %arg2: i32) -> (i32, i32) {
    %c0_i32 = arith.constant 0 : i32
    return %arg0, %arg1 : i32, i32
  }
}

module attributes {stable_mosaic.version = 11 : i64} {
  func.func @_fused_matmul_kernel(%arg0: i32, %arg1: i32, %arg2: i32, %arg3: memref<16x128xf32, #tpu.memory_space<vmem>>, %arg4: memref<128x128xbf16, #tpu.memory_space<vmem>>, %arg5: memref<1x128xf32, #tpu.memory_space<vmem>>, %arg6: memref<16x128xf32, #tpu.memory_space<vmem>>, %arg7: memref<16x128xf32, #tpu.memory_space<vmem>>) attributes {dimension_semantics = [#tpu.dimension_semantics<parallel>, #tpu.dimension_semantics<parallel>, #tpu.dimension_semantics<arbitrary>], iteration_bounds = array<i64: 1, 1, 1>, scalar_prefetch = 0 : i64, scratch_operands = 1 : i64, tpu.core_type = #tpu.core_type<tc>, window_params = [{transform_indices = @transform_0, window_bounds = array<i64: 16, 128>}, {transform_indices = @transform_1, window_bounds = array<i64: 128, 128>}, {transform_indices = @transform_2, window_bounds = array<i64: 1, 128>}, {transform_indices = @transform_3, window_bounds = array<i64: 16, 128>}]} {
    %c0_i32 = arith.constant 0 : i32
    %0 = arith.cmpi eq, %arg2, %c0_i32 : i32
    %1 = arith.extui %0 : i1 to i32
    %c0_i32_0 = arith.constant 0 : i32
    %2 = arith.cmpi ne, %1, %c0_i32_0 : i32
    scf.if %2 {
      %cst_10 = arith.constant 0.000000e+00 : f32
      %13 = vector.broadcast %cst_10 : f32 to vector<16x128xf32>
      %c0_11 = arith.constant 0 : index
      %c0_12 = arith.constant 0 : index
      %14 = vector.load %arg7[%c0_11, %c0_12] : memref<16x128xf32, #tpu.memory_space<vmem>>, vector<16x128xf32>
      tpu.vector_store %arg7[%c0_11, %c0_12], %13 {strides = array<i32>} : memref<16x128xf32, #tpu.memory_space<vmem>>, vector<16x128xf32>,
    } else {
    }
    %c0 = arith.constant 0 : index
    %c0_1 = arith.constant 0 : index
    %3 = vector.load %arg3[%c0, %c0_1] : memref<16x128xf32, #tpu.memory_space<vmem>>, vector<16x128xf32>
    %4 = arith.truncf %3 : vector<16x128xf32> to vector<16x128xbf16>
    %c0_2 = arith.constant 0 : index
    %c0_3 = arith.constant 0 : index
    %5 = vector.load %arg4[%c0_2, %c0_3] : memref<128x128xbf16, #tpu.memory_space<vmem>>, vector<128x128xbf16>
    %c0_4 = arith.constant 0 : index
    %c0_5 = arith.constant 0 : index
    %6 = vector.load %arg7[%c0_4, %c0_5] : memref<16x128xf32, #tpu.memory_space<vmem>>, vector<16x128xf32>
    %cst = arith.constant dense<0.000000e+00> : vector<16x128xf32>
    %7 = tpu.matmul %4, %5, %cst {dimension_numbers = #tpu.dot_dimension_numbers<[1], [0], [0], [1], [0, 0, 1, 1], [], []>} : vector<16x128xbf16>, vector<128x128xbf16>, vector<16x128xf32> -> vector<16x128xf32>
    %8 = arith.addf %6, %7 : vector<16x128xf32>
    %c0_6 = arith.constant 0 : index
    %c0_7 = arith.constant 0 : index
    %9 = vector.load %arg7[%c0_6, %c0_7] : memref<16x128xf32, #tpu.memory_space<vmem>>, vector<16x128xf32>
    tpu.vector_store %arg7[%c0_6, %c0_7], %8 {strides = array<i32>} : memref<16x128xf32, #tpu.memory_space<vmem>>, vector<16x128xf32>,
    %c0_i32_8 = arith.constant 0 : i32
    %10 = arith.cmpi eq, %arg2, %c0_i32_8 : i32
    %11 = arith.extui %10 : i1 to i32
    %c0_i32_9 = arith.constant 0 : i32
    %12 = arith.cmpi ne, %11, %c0_i32_9 : i32
    scf.if %12 {
      %c0_10 = arith.constant 0 : index
      %c0_11 = arith.constant 0 : index
      %13 = vector.load %arg7[%c0_10, %c0_11] : memref<16x128xf32, #tpu.memory_space<vmem>>, vector<16x128xf32>
      %c0_12 = arith.constant 0 : index
      %c0_13 = arith.constant 0 : index
      %14 = vector.load %arg5[%c0_12, %c0_13] : memref<1x128xf32, #tpu.memory_space<vmem>>, vector<1x128xf32>
      %15 = vector.broadcast %14 : vector<1x128xf32> to vector<16x128xf32>
      %16 = arith.addf %13, %15 : vector<16x128xf32>
      %cst_14 = arith.constant 0.000000e+00 : f32
      %17 = vector.broadcast %cst_14 : f32 to vector<16x128xf32>
      %18 = arith.maximumf %16, %17 : vector<16x128xf32>
      %c0_15 = arith.constant 0 : index
      %c0_16 = arith.constant 0 : index
      %19 = vector.load %arg6[%c0_15, %c0_16] : memref<16x128xf32, #tpu.memory_space<vmem>>, vector<16x128xf32>
      tpu.vector_store %arg6[%c0_15, %c0_16], %18 {strides = array<i32>} : memref<16x128xf32, #tpu.memory_space<vmem>>, vector<16x128xf32>,
    } else {
    }
    return
  }
  func.func @transform_0(%arg0: i32, %arg1: i32, %arg2: i32) -> (i32, i32) {
    %c0_i32 = arith.constant 0 : i32
    return %arg0, %arg2 : i32, i32
  }
  func.func @transform_1(%arg0: i32, %arg1: i32, %arg2: i32) -> (i32, i32) {
    %c0_i32 = arith.constant 0 : i32
    return %arg2, %arg1 : i32, i32
  }
  func.func @transform_2(%arg0: i32, %arg1: i32, %arg2: i32) -> (i32, i32) {
    %c0_i32 = arith.constant 0 : i32
    %c0_i32_0 = arith.constant 0 : i32
    return %c0_i32, %arg1 : i32, i32
  }
  func.func @transform_3(%arg0: i32, %arg1: i32, %arg2: i32) -> (i32, i32) {
    %c0_i32 = arith.constant 0 : i32
    return %arg0, %arg1 : i32, i32
  }
}

module attributes {stable_mosaic.version = 11 : i64} {
  func.func @_fused_matmul_kernel(%arg0: i32, %arg1: i32, %arg2: i32, %arg3: memref<16x128xf32, #tpu.memory_space<vmem>>, %arg4: memref<128x128xbf16, #tpu.memory_space<vmem>>, %arg5: memref<1x128xf32, #tpu.memory_space<vmem>>, %arg6: memref<16x128xf32, #tpu.memory_space<vmem>>, %arg7: memref<1x128xf32, #tpu.memory_space<vmem>>, %arg8: memref<1x128xf32, #tpu.memory_space<vmem>>, %arg9: memref<16x128xf32, #tpu.memory_space<vmem>>, %arg10: memref<16x128xf32, #tpu.memory_space<vmem>>) attributes {dimension_semantics = [#tpu.dimension_semantics<parallel>, #tpu.dimension_semantics<parallel>, #tpu.dimension_semantics<arbitrary>], iteration_bounds = array<i64: 1, 1, 1>, scalar_prefetch = 0 : i64, scratch_operands = 1 : i64, tpu.core_type = #tpu.core_type<tc>, window_params = [{transform_indices = @transform_0, window_bounds = array<i64: 16, 128>}, {transform_indices = @transform_1, window_bounds = array<i64: 128, 128>}, {transform_indices = @transform_2, window_bounds = array<i64: 1, 128>}, {transform_indices = @transform_3, window_bounds = array<i64: 16, 128>}, {transform_indices = @transform_4, window_bounds = array<i64: 1, 128>}, {transform_indices = @transform_5, window_bounds = array<i64: 1, 128>}, {transform_indices = @transform_6, window_bounds = array<i64: 16, 128>}]} {
    %c0_i32 = arith.constant 0 : i32
    %0 = arith.cmpi eq, %arg2, %c0_i32 : i32
    %1 = arith.extui %0 : i1 to i32
    %c0_i32_0 = arith.constant 0 : i32
    %2 = arith.cmpi ne, %1, %c0_i32_0 : i32
    scf.if %2 {
      %cst_10 = arith.constant 0.000000e+00 : f32
      %13 = vector.broadcast %cst_10 : f32 to vector<16x128xf32>
      %c0_11 = arith.constant 0 : index
      %c0_12 = arith.constant 0 : index
      %14 = vector.load %arg10[%c0_11, %c0_12] : memref<16x128xf32, #tpu.memory_space<vmem>>, vector<16x128xf32>
      tpu.vector_store %arg10[%c0_11, %c0_12], %13 {strides = array<i32>} : memref<16x128xf32, #tpu.memory_space<vmem>>, vector<16x128xf32>,
    } else {
    }
    %c0 = arith.constant 0 : index
    %c0_1 = arith.constant 0 : index
    %3 = vector.load %arg3[%c0, %c0_1] : memref<16x128xf32, #tpu.memory_space<vmem>>, vector<16x128xf32>
    %4 = arith.truncf %3 : vector<16x128xf32> to vector<16x128xbf16>
    %c0_2 = arith.constant 0 : index
    %c0_3 = arith.constant 0 : index
    %5 = vector.load %arg4[%c0_2, %c0_3] : memref<128x128xbf16, #tpu.memory_space<vmem>>, vector<128x128xbf16>
    %c0_4 = arith.constant 0 : index
    %c0_5 = arith.constant 0 : index
    %6 = vector.load %arg10[%c0_4, %c0_5] : memref<16x128xf32, #tpu.memory_space<vmem>>, vector<16x128xf32>
    %cst = arith.constant dense<0.000000e+00> : vector<16x128xf32>
    %7 = tpu.matmul %4, %5, %cst {dimension_numbers = #tpu.dot_dimension_numbers<[1], [0], [0], [1], [0, 0, 1, 1], [], []>} : vector<16x128xbf16>, vector<128x128xbf16>, vector<16x128xf32> -> vector<16x128xf32>
    %8 = arith.addf %6, %7 : vector<16x128xf32>
    %c0_6 = arith.constant 0 : index
    %c0_7 = arith.constant 0 : index
    %9 = vector.load %arg10[%c0_6, %c0_7] : memref<16x128xf32, #tpu.memory_space<vmem>>, vector<16x128xf32>
    tpu.vector_store %arg10[%c0_6, %c0_7], %8 {strides = array<i32>} : memref<16x128xf32, #tpu.memory_space<vmem>>, vector<16x128xf32>,
    %c0_i32_8 = arith.constant 0 : i32
    %10 = arith.cmpi eq, %arg2, %c0_i32_8 : i32
    %11 = arith.extui %10 : i1 to i32
    %c0_i32_9 = arith.constant 0 : i32
    %12 = arith.cmpi ne, %11, %c0_i32_9 : i32
    scf.if %12 {
      %c0_10 = arith.constant 0 : index
      %c0_11 = arith.constant 0 : index
      %13 = vector.load %arg10[%c0_10, %c0_11] : memref<16x128xf32, #tpu.memory_space<vmem>>, vector<16x128xf32>
      %c0_12 = arith.constant 0 : index
      %c0_13 = arith.constant 0 : index
      %14 = vector.load %arg5[%c0_12, %c0_13] : memref<1x128xf32, #tpu.memory_space<vmem>>, vector<1x128xf32>
      %15 = vector.broadcast %14 : vector<1x128xf32> to vector<16x128xf32>
      %16 = arith.addf %13, %15 : vector<16x128xf32>
      %c0_14 = arith.constant 0 : index
      %c0_15 = arith.constant 0 : index
      %17 = vector.load %arg6[%c0_14, %c0_15] : memref<16x128xf32, #tpu.memory_space<vmem>>, vector<16x128xf32>
      %18 = arith.addf %16, %17 : vector<16x128xf32>
      %cst_16 = arith.constant dense<0.000000e+00> : vector<16xf32>
      %19 = vector.multi_reduction <add>, %18, %cst_16 [1] : vector<16x128xf32> to vector<16xf32>
      %20 = vector.shape_cast %19 : vector<16xf32> to vector<16x1xf32>
      %cst_17 = arith.constant 3.125000e-02 : f32
      %21 = vector.broadcast %cst_17 : f32 to vector<16x1xf32>
      %22 = arith.mulf %20, %21 : vector<16x1xf32>
      %23 = arith.mulf %18, %18 : vector<16x128xf32>
      %cst_18 = arith.constant dense<0.000000e+00> : vector<16xf32>
      %24 = vector.multi_reduction <add>, %23, %cst_18 [1] : vector<16x128xf32> to vector<16xf32>
      %25 = vector.shape_cast %24 : vector<16xf32> to vector<16x1xf32>
      %cst_19 = arith.constant 3.125000e-02 : f32
      %26 = vector.broadcast %cst_19 : f32 to vector<16x1xf32>
      %27 = arith.mulf %25, %26 : vector<16x1xf32>
      %28 = arith.mulf %22, %22 : vector<16x1xf32>
      %29 = arith.subf %27, %28 : vector<16x1xf32>
      %30 = vector.broadcast %22 : vector<16x1xf32> to vector<16x128xf32>
      %31 = arith.subf %18, %30 : vector<16x128xf32>
      %cst_20 = arith.constant 9.99999997E-7 : f32
      %32 = vector.broadcast %cst_20 : f32 to vector<16x1xf32>
      %33 = arith.addf %29, %32 : vector<16x1xf32>
      %34 = math.rsqrt %33 : vector<16x1xf32>
      %35 = vector.broadcast %34 : vector<16x1xf32> to vector<16x128xf32>
      %36 = arith.mulf %31, %35 : vector<16x128xf32>
      %c0_21 = arith.constant 0 : index
      %c0_22 = arith.constant 0 : index
      %37 = vector.load %arg7[%c0_21, %c0_22] : memref<1x128xf32, #tpu.memory_space<vmem>>, vector<1x128xf32>
      %38 = vector.broadcast %37 : vector<1x128xf32> to vector<16x128xf32>
      %39 = arith.mulf %36, %38 : vector<16x128xf32>
      %c0_23 = arith.constant 0 : index
      %c0_24 = arith.constant 0 : index
      %40 = vector.load %arg8[%c0_23, %c0_24] : memref<1x128xf32, #tpu.memory_space<vmem>>, vector<1x128xf32>
      %41 = vector.broadcast %40 : vector<1x128xf32> to vector<16x128xf32>
      %42 = arith.addf %39, %41 : vector<16x128xf32>
      %c0_25 = arith.constant 0 : index
      %c0_26 = arith.constant 0 : index
      %43 = vector.load %arg9[%c0_25, %c0_26] : memref<16x128xf32, #tpu.memory_space<vmem>>, vector<16x128xf32>
      tpu.vector_store %arg9[%c0_25, %c0_26], %42 {strides = array<i32>} : memref<16x128xf32, #tpu.memory_space<vmem>>, vector<16x128xf32>,
    } else {
    }
    return
  }
  func.func @transform_0(%arg0: i32, %arg1: i32, %arg2: i32) -> (i32, i32) {
    %c0_i32 = arith.constant 0 : i32
    return %arg0, %arg2 : i32, i32
  }
  func.func @transform_1(%arg0: i32, %arg1: i32, %arg2: i32) -> (i32, i32) {
    %c0_i32 = arith.constant 0 : i32
    return %arg2, %arg1 : i32, i32
  }
  func.func @transform_2(%arg0: i32, %arg1: i32, %arg2: i32) -> (i32, i32) {
    %c0_i32 = arith.constant 0 : i32
    %c0_i32_0 = arith.constant 0 : i32
    return %c0_i32, %arg1 : i32, i32
  }
  func.func @transform_3(%arg0: i32, %arg1: i32, %arg2: i32) -> (i32, i32) {
    %c0_i32 = arith.constant 0 : i32
    return %arg0, %arg1 : i32, i32
  }
  func.func @transform_4(%arg0: i32, %arg1: i32, %arg2: i32) -> (i32, i32) {
    %c0_i32 = arith.constant 0 : i32
    %c0_i32_0 = arith.constant 0 : i32
    return %c0_i32, %arg1 : i32, i32
  }
  func.func @transform_5(%arg0: i32, %arg1: i32, %arg2: i32) -> (i32, i32) {
    %c0_i32 = arith.constant 0 : i32
    %c0_i32_0 = arith.constant 0 : i32
    return %c0_i32, %arg1 : i32, i32
  }
  func.func @transform_6(%arg0: i32, %arg1: i32, %arg2: i32) -> (i32, i32) {
    %c0_i32 = arith.constant 0 : i32
    return %arg0, %arg1 : i32, i32
  }
}

module attributes {stable_mosaic.version = 11 : i64} {
  func.func @_fused_matmul_kernel(%arg0: i32, %arg1: i32, %arg2: i32, %arg3: memref<16x128xf32, #tpu.memory_space<vmem>>, %arg4: memref<128x256xbf16, #tpu.memory_space<vmem>>, %arg5: memref<16x256xf32, #tpu.memory_space<vmem>>, %arg6: memref<16x256xf32, #tpu.memory_space<vmem>>) attributes {dimension_semantics = [#tpu.dimension_semantics<parallel>, #tpu.dimension_semantics<parallel>, #tpu.dimension_semantics<arbitrary>], iteration_bounds = array<i64: 1, 1, 1>, scalar_prefetch = 0 : i64, scratch_operands = 1 : i64, tpu.core_type = #tpu.core_type<tc>, window_params = [{transform_indices = @transform_0, window_bounds = array<i64: 16, 128>}, {transform_indices = @transform_1, window_bounds = array<i64: 128, 256>}, {transform_indices = @transform_2, window_bounds = array<i64: 16, 256>}]} {
    %c0_i32 = arith.constant 0 : i32
    %0 = arith.cmpi eq, %arg2, %c0_i32 : i32
    %1 = arith.extui %0 : i1 to i32
    %c0_i32_0 = arith.constant 0 : i32
    %2 = arith.cmpi ne, %1, %c0_i32_0 : i32
    scf.if %2 {
      %cst_10 = arith.constant 0.000000e+00 : f32
      %13 = vector.broadcast %cst_10 : f32 to vector<16x256xf32>
      %c0_11 = arith.constant 0 : index
      %c0_12 = arith.constant 0 : index
      %14 = vector.load %arg6[%c0_11, %c0_12] : memref<16x256xf32, #tpu.memory_space<vmem>>, vector<16x256xf32>
      tpu.vector_store %arg6[%c0_11, %c0_12], %13 {strides = array<i32>} : memref<16x256xf32, #tpu.memory_space<vmem>>, vector<16x256xf32>,
    } else {
    }
    %c0 = arith.constant 0 : index
    %c0_1 = arith.constant 0 : index
    %3 = vector.load %arg3[%c0, %c0_1] : memref<16x128xf32, #tpu.memory_space<vmem>>, vector<16x128xf32>
    %4 = arith.truncf %3 : vector<16x128xf32> to vector<16x128xbf16>
    %c0_2 = arith.constant 0 : index
    %c0_3 = arith.constant 0 : index
    %5 = vector.load %arg4[%c0_2, %c0_3] : memref<128x256xbf16, #tpu.memory_space<vmem>>, vector<128x256xbf16>
    %c0_4 = arith.constant 0 : index
    %c0_5 = arith.constant 0 : index
    %6 = vector.load %arg6[%c0_4, %c0_5] : memref<16x256xf32, #tpu.memory_space<vmem>>, vector<16x256xf32>
    %cst = arith.constant dense<0.000000e+00> : vector<16x256xf32>
    %7 = tpu.matmul %4, %5, %cst {dimension_numbers = #tpu.dot_dimension_numbers<[1], [0], [0], [1], [0, 0, 1, 1], [], []>} : vector<16x128xbf16>, vector<128x256xbf16>, vector<16x256xf32> -> vector<16x256xf32>
    %8 = arith.addf %6, %7 : vector<16x256xf32>
    %c0_6 = arith.constant 0 : index
    %c0_7 = arith.constant 0 : index
    %9 = vector.load %arg6[%c0_6, %c0_7] : memref<16x256xf32, #tpu.memory_space<vmem>>, vector<16x256xf32>
    tpu.vector_store %arg6[%c0_6, %c0_7], %8 {strides = array<i32>} : memref<16x256xf32, #tpu.memory_space<vmem>>, vector<16x256xf32>,
    %c0_i32_8 = arith.constant 0 : i32
    %10 = arith.cmpi eq, %arg2, %c0_i32_8 : i32
    %11 = arith.extui %10 : i1 to i32
    %c0_i32_9 = arith.constant 0 : i32
    %12 = arith.cmpi ne, %11, %c0_i32_9 : i32
    scf.if %12 {
      %c0_10 = arith.constant 0 : index
      %c0_11 = arith.constant 0 : index
      %13 = vector.load %arg6[%c0_10, %c0_11] : memref<16x256xf32, #tpu.memory_space<vmem>>, vector<16x256xf32>
      %c0_12 = arith.constant 0 : index
      %c0_13 = arith.constant 0 : index
      %14 = vector.load %arg5[%c0_12, %c0_13] : memref<16x256xf32, #tpu.memory_space<vmem>>, vector<16x256xf32>
      tpu.vector_store %arg5[%c0_12, %c0_13], %13 {strides = array<i32>} : memref<16x256xf32, #tpu.memory_space<vmem>>, vector<16x256xf32>,
    } else {
    }
    return
  }
  func.func @transform_0(%arg0: i32, %arg1: i32, %arg2: i32) -> (i32, i32) {
    %c0_i32 = arith.constant 0 : i32
    return %arg0, %arg2 : i32, i32
  }
  func.func @transform_1(%arg0: i32, %arg1: i32, %arg2: i32) -> (i32, i32) {
    %c0_i32 = arith.constant 0 : i32
    return %arg2, %arg1 : i32, i32
  }
  func.func @transform_2(%arg0: i32, %arg1: i32, %arg2: i32) -> (i32, i32) {
    %c0_i32 = arith.constant 0 : i32
    return %arg0, %arg1 : i32, i32
  }
}

module attributes {stable_mosaic.version = 11 : i64} {
  func.func @_fused_matmul_kernel(%arg0: i32, %arg1: i32, %arg2: i32, %arg3: memref<16x128xf32, #tpu.memory_space<vmem>>, %arg4: memref<128x256xbf16, #tpu.memory_space<vmem>>, %arg5: memref<16x256xf32, #tpu.memory_space<vmem>>, %arg6: memref<16x256xf32, #tpu.memory_space<vmem>>) attributes {dimension_semantics = [#tpu.dimension_semantics<parallel>, #tpu.dimension_semantics<parallel>, #tpu.dimension_semantics<arbitrary>], iteration_bounds = array<i64: 1, 1, 1>, scalar_prefetch = 0 : i64, scratch_operands = 1 : i64, tpu.core_type = #tpu.core_type<tc>, window_params = [{transform_indices = @transform_0, window_bounds = array<i64: 16, 128>}, {transform_indices = @transform_1, window_bounds = array<i64: 128, 256>}, {transform_indices = @transform_2, window_bounds = array<i64: 16, 256>}]} {
    %c0_i32 = arith.constant 0 : i32
    %0 = arith.cmpi eq, %arg2, %c0_i32 : i32
    %1 = arith.extui %0 : i1 to i32
    %c0_i32_0 = arith.constant 0 : i32
    %2 = arith.cmpi ne, %1, %c0_i32_0 : i32
    scf.if %2 {
      %cst_10 = arith.constant 0.000000e+00 : f32
      %13 = vector.broadcast %cst_10 : f32 to vector<16x256xf32>
      %c0_11 = arith.constant 0 : index
      %c0_12 = arith.constant 0 : index
      %14 = vector.load %arg6[%c0_11, %c0_12] : memref<16x256xf32, #tpu.memory_space<vmem>>, vector<16x256xf32>
      tpu.vector_store %arg6[%c0_11, %c0_12], %13 {strides = array<i32>} : memref<16x256xf32, #tpu.memory_space<vmem>>, vector<16x256xf32>,
    } else {
    }
    %c0 = arith.constant 0 : index
    %c0_1 = arith.constant 0 : index
    %3 = vector.load %arg3[%c0, %c0_1] : memref<16x128xf32, #tpu.memory_space<vmem>>, vector<16x128xf32>
    %4 = arith.truncf %3 : vector<16x128xf32> to vector<16x128xbf16>
    %c0_2 = arith.constant 0 : index
    %c0_3 = arith.constant 0 : index
    %5 = vector.load %arg4[%c0_2, %c0_3] : memref<128x256xbf16, #tpu.memory_space<vmem>>, vector<128x256xbf16>
    %c0_4 = arith.constant 0 : index
    %c0_5 = arith.constant 0 : index
    %6 = vector.load %arg6[%c0_4, %c0_5] : memref<16x256xf32, #tpu.memory_space<vmem>>, vector<16x256xf32>
    %cst = arith.constant dense<0.000000e+00> : vector<16x256xf32>
    %7 = tpu.matmul %4, %5, %cst {dimension_numbers = #tpu.dot_dimension_numbers<[1], [0], [0], [1], [0, 0, 1, 1], [], []>} : vector<16x128xbf16>, vector<128x256xbf16>, vector<16x256xf32> -> vector<16x256xf32>
    %8 = arith.addf %6, %7 : vector<16x256xf32>
    %c0_6 = arith.constant 0 : index
    %c0_7 = arith.constant 0 : index
    %9 = vector.load %arg6[%c0_6, %c0_7] : memref<16x256xf32, #tpu.memory_space<vmem>>, vector<16x256xf32>
    tpu.vector_store %arg6[%c0_6, %c0_7], %8 {strides = array<i32>} : memref<16x256xf32, #tpu.memory_space<vmem>>, vector<16x256xf32>,
    %c0_i32_8 = arith.constant 0 : i32
    %10 = arith.cmpi eq, %arg2, %c0_i32_8 : i32
    %11 = arith.extui %10 : i1 to i32
    %c0_i32_9 = arith.constant 0 : i32
    %12 = arith.cmpi ne, %11, %c0_i32_9 : i32
    scf.if %12 {
      %c0_10 = arith.constant 0 : index
      %c0_11 = arith.constant 0 : index
      %13 = vector.load %arg6[%c0_10, %c0_11] : memref<16x256xf32, #tpu.memory_space<vmem>>, vector<16x256xf32>
      %c0_12 = arith.constant 0 : index
      %c0_13 = arith.constant 0 : index
      %14 = vector.load %arg5[%c0_12, %c0_13] : memref<16x256xf32, #tpu.memory_space<vmem>>, vector<16x256xf32>
      tpu.vector_store %arg5[%c0_12, %c0_13], %13 {strides = array<i32>} : memref<16x256xf32, #tpu.memory_space<vmem>>, vector<16x256xf32>,
    } else {
    }
    return
  }
  func.func @transform_0(%arg0: i32, %arg1: i32, %arg2: i32) -> (i32, i32) {
    %c0_i32 = arith.constant 0 : i32
    return %arg0, %arg2 : i32, i32
  }
  func.func @transform_1(%arg0: i32, %arg1: i32, %arg2: i32) -> (i32, i32) {
    %c0_i32 = arith.constant 0 : i32
    return %arg2, %arg1 : i32, i32
  }
  func.func @transform_2(%arg0: i32, %arg1: i32, %arg2: i32) -> (i32, i32) {
    %c0_i32 = arith.constant 0 : i32
    return %arg0, %arg1 : i32, i32
  }
}

module attributes {stable_mosaic.version = 11 : i64} {
  func.func @_mha_kernel(%arg0: i32, %arg1: memref<1x8x128xf32, #tpu.memory_space<vmem>>, %arg2: memref<1x8x128xf32, #tpu.memory_space<vmem>>, %arg3: memref<1x8x128xf32, #tpu.memory_space<vmem>>, %arg4: memref<1x8x8xi32, #tpu.memory_space<vmem>>, %arg5: memref<1x8x128xf32, #tpu.memory_space<vmem>>) attributes {dimension_semantics = [#tpu.dimension_semantics<parallel>], iteration_bounds = array<i64: 2>, scalar_prefetch = 0 : i64, scratch_operands = 0 : i64, tpu.core_type = #tpu.core_type<tc>, window_params = [{transform_indices = @transform_0, window_bounds = array<i64: 1, 8, 128>}, {transform_indices = @transform_1, window_bounds = array<i64: 1, 8, 128>}, {transform_indices = @transform_2, window_bounds = array<i64: 1, 8, 128>}, {transform_indices = @transform_3, window_bounds = array<i64: 1, 8, 8>}, {transform_indices = @transform_4, window_bounds = array<i64: 1, 8, 128>}]} {
    %c0 = arith.constant 0 : index
    %c0_0 = arith.constant 0 : index
    %c0_1 = arith.constant 0 : index
    %0 = vector.load %arg4[%c0, %c0_0, %c0_1] : memref<1x8x8xi32, #tpu.memory_space<vmem>>, vector<1x8x8xi32>
    %1 = vector.shape_cast %0 : vector<1x8x8xi32> to vector<8x8xi32>
    %c0_i32 = arith.constant 0 : i32
    %2 = vector.broadcast %c0_i32 : i32 to vector<8x8xi32>
    %3 = arith.cmpi sgt, %1, %2 : vector<8x8xi32>
    %cst = arith.constant 0.000000e+00 : f32
    %cst_2 = arith.constant -1.000000e+09 : f32
    %4 = vector.broadcast %cst : f32 to vector<8x8xf32>
    %5 = vector.broadcast %cst_2 : f32 to vector<8x8xf32>
    %6 = arith.select %3, %4, %5 : vector<8x8xi1>, vector<8x8xf32>
    %c0_3 = arith.constant 0 : index
    %c0_4 = arith.constant 0 : index
    %c0_5 = arith.constant 0 : index
    %7 = vector.load %arg1[%c0_3, %c0_4, %c0_5] : memref<1x8x128xf32, #tpu.memory_space<vmem>>, vector<1x8x128xf32>
    %8 = vector.shape_cast %7 : vector<1x8x128xf32> to vector<8x128xf32>
    %c0_6 = arith.constant 0 : index
    %c0_7 = arith.constant 0 : index
    %c0_8 = arith.constant 0 : index
    %9 = vector.load %arg2[%c0_6, %c0_7, %c0_8] : memref<1x8x128xf32, #tpu.memory_space<vmem>>, vector<1x8x128xf32>
    %10 = vector.shape_cast %9 : vector<1x8x128xf32> to vector<8x128xf32>
    %c0_9 = arith.constant 0 : index
    %c0_10 = arith.constant 0 : index
    %c0_11 = arith.constant 0 : index
    %11 = vector.load %arg3[%c0_9, %c0_10, %c0_11] : memref<1x8x128xf32, #tpu.memory_space<vmem>>, vector<1x8x128xf32>
    %12 = vector.shape_cast %11 : vector<1x8x128xf32> to vector<8x128xf32>
    %13 = vector.extract_strided_slice %8 {offsets = [0, 0], sizes = [8, 64], strides = [1, 1]} : vector<8x128xf32> to vector<8x64xf32>
    %14 = vector.extract_strided_slice %10 {offsets = [0, 0], sizes = [8, 64], strides = [1, 1]} : vector<8x128xf32> to vector<8x64xf32>
    %15 = vector.extract_strided_slice %12 {offsets = [0, 0], sizes = [8, 64], strides = [1, 1]} : vector<8x128xf32> to vector<8x64xf32>
    %cst_12 = arith.constant dense<0.000000e+00> : vector<8x8xf32>
    %16 = tpu.matmul %13, %14, %cst_12 {dimension_numbers = #tpu.dot_dimension_numbers<[1], [1], [0], [0], [0, 0, 1, 0], [], []>} : vector<8x64xf32>, vector<8x64xf32>, vector<8x8xf32> -> vector<8x8xf32>
    %cst_13 = arith.constant 2.500000e-01 : f32
    %17 = vector.broadcast %cst_13 : f32 to vector<8x8xf32>
    %18 = arith.mulf %16, %17 : vector<8x8xf32>
    %19 = arith.addf %18, %6 : vector<8x8xf32>
    %cst_14 = arith.constant dense<0xFF800000> : vector<8xf32>
    %20 = vector.multi_reduction <maximumf>, %19, %cst_14 [1] : vector<8x8xf32> to vector<8xf32>
    %21 = vector.shape_cast %20 : vector<8xf32> to vector<8x1xf32>
    %22 = vector.broadcast %21 : vector<8x1xf32> to vector<8x8xf32>
    %23 = arith.subf %19, %22 : vector<8x8xf32>
    %24 = math.exp %23 : vector<8x8xf32>
    %cst_15 = arith.constant dense<0.000000e+00> : vector<8xf32>
    %25 = vector.multi_reduction <add>, %24, %cst_15 [1] : vector<8x8xf32> to vector<8xf32>
    %26 = vector.shape_cast %25 : vector<8xf32> to vector<8x1xf32>
    %27 = tpu.reciprocal %26 {approx = true} : vector<8x1xf32> -> vector<8x1xf32>
    %28 = vector.broadcast %27 : vector<8x1xf32> to vector<8x8xf32>
    %29 = arith.mulf %24, %28 : vector<8x8xf32>
    %cst_16 = arith.constant dense<0.000000e+00> : vector<8x64xf32>
    %30 = tpu.matmul %29, %15, %cst_16 {dimension_numbers = #tpu.dot_dimension_numbers<[1], [0], [0], [1], [0, 0, 1, 1], [], []>} : vector<8x8xf32>, vector<8x64xf32>, vector<8x64xf32> -> vector<8x64xf32>
    %31 = vector.extract_strided_slice %8 {offsets = [0, 64], sizes = [8, 64], strides = [1, 1]} : vector<8x128xf32> to vector<8x64xf32>
    %32 = vector.extract_strided_slice %10 {offsets = [0, 64], sizes = [8, 64], strides = [1, 1]} : vector<8x128xf32> to vector<8x64xf32>
    %33 = vector.extract_strided_slice %12 {offsets = [0, 64], sizes = [8, 64], strides = [1, 1]} : vector<8x128xf32> to vector<8x64xf32>
    %cst_17 = arith.constant dense<0.000000e+00> : vector<8x8xf32>
    %34 = tpu.matmul %31, %32, %cst_17 {dimension_numbers = #tpu.dot_dimension_numbers<[1], [1], [0], [0], [0, 0, 1, 0], [], []>} : vector<8x64xf32>, vector<8x64xf32>, vector<8x8xf32> -> vector<8x8xf32>
    %cst_18 = arith.constant 2.500000e-01 : f32
    %35 = vector.broadcast %cst_18 : f32 to vector<8x8xf32>
    %36 = arith.mulf %34, %35 : vector<8x8xf32>
    %37 = arith.addf %36, %6 : vector<8x8xf32>
    %cst_19 = arith.constant dense<0xFF800000> : vector<8xf32>
    %38 = vector.multi_reduction <maximumf>, %37, %cst_19 [1] : vector<8x8xf32> to vector<8xf32>
    %39 = vector.shape_cast %38 : vector<8xf32> to vector<8x1xf32>
    %40 = vector.broadcast %39 : vector<8x1xf32> to vector<8x8xf32>
    %41 = arith.subf %37, %40 : vector<8x8xf32>
    %42 = math.exp %41 : vector<8x8xf32>
    %cst_20 = arith.constant dense<0.000000e+00> : vector<8xf32>
    %43 = vector.multi_reduction <add>, %42, %cst_20 [1] : vector<8x8xf32> to vector<8xf32>
    %44 = vector.shape_cast %43 : vector<8xf32> to vector<8x1xf32>
    %45 = tpu.reciprocal %44 {approx = true} : vector<8x1xf32> -> vector<8x1xf32>
    %46 = vector.broadcast %45 : vector<8x1xf32> to vector<8x8xf32>
    %47 = arith.mulf %42, %46 : vector<8x8xf32>
    %cst_21 = arith.constant dense<0.000000e+00> : vector<8x64xf32>
    %48 = tpu.matmul %47, %33, %cst_21 {dimension_numbers = #tpu.dot_dimension_numbers<[1], [0], [0], [1], [0, 0, 1, 1], [], []>} : vector<8x8xf32>, vector<8x64xf32>, vector<8x64xf32> -> vector<8x64xf32>
    %49 = tpu.concatenate %30, %48 in 1 : vector<8x64xf32>, vector<8x64xf32> -> vector<8x128xf32>
    %c0_22 = arith.constant 0 : index
    %c0_23 = arith.constant 0 : index
    %c0_24 = arith.constant 0 : index
    %50 = vector.load %arg5[%c0_22, %c0_23, %c0_24] : memref<1x8x128xf32, #tpu.memory_space<vmem>>, vector<1x8x128xf32>
    %51 = vector.shape_cast %50 : vector<1x8x128xf32> to vector<8x128xf32>
    %52 = vector.shape_cast %49 : vector<8x128xf32> to vector<1x8x128xf32>
    tpu.vector_store %arg5[%c0_22, %c0_23, %c0_24], %52 {strides = array<i32>} : memref<1x8x128xf32, #tpu.memory_space<vmem>>, vector<1x8x128xf32>,
    return
  }
  func.func @transform_0(%arg0: i32) -> (i32, i32, i32) {
    %c0_i32 = arith.constant 0 : i32
    %c0_i32_0 = arith.constant 0 : i32
    %c0_i32_1 = arith.constant 0 : i32
    return %arg0, %c0_i32, %c0_i32_0 : i32, i32, i32
  }
  func.func @transform_1(%arg0: i32) -> (i32, i32, i32) {
    %c0_i32 = arith.constant 0 : i32
    %c0_i32_0 = arith.constant 0 : i32
    %c0_i32_1 = arith.constant 0 : i32
    return %arg0, %c0_i32, %c0_i32_0 : i32, i32, i32
  }
  func.func @transform_2(%arg0: i32) -> (i32, i32, i32) {
    %c0_i32 = arith.constant 0 : i32
    %c1_i32 = arith.constant 1 : i32
    %c0_i32_0 = arith.constant 0 : i32
    return %arg0, %c0_i32, %c1_i32 : i32, i32, i32
  }
  func.func @transform_3(%arg0: i32) -> (i32, i32, i32) {
    %c0_i32 = arith.constant 0 : i32
    %c0_i32_0 = arith.constant 0 : i32
    %c0_i32_1 = arith.constant 0 : i32
    return %arg0, %c0_i32, %c0_i32_0 : i32, i32, i32
  }
  func.func @transform_4(%arg0: i32) -> (i32, i32, i32) {
    %c0_i32 = arith.constant 0 : i32
    %c0_i32_0 = arith.constant 0 : i32
    %c0_i32_1 = arith.constant 0 : i32
    return %arg0, %c0_i32, %c0_i32_0 : i32, i32, i32
  }
}

module attributes {stable_mosaic.version = 11 : i64} {
  func.func @_fused_matmul_kernel(%arg0: i32, %arg1: i32, %arg2: i32, %arg3: memref<16x128xf32, #tpu.memory_space<vmem>>, %arg4: memref<128x128xf32, #tpu.memory_space<vmem>>, %arg5: memref<16x128xf32, #tpu.memory_space<vmem>>, %arg6: memref<16x128xf32, #tpu.memory_space<vmem>>) attributes {dimension_semantics = [#tpu.dimension_semantics<parallel>, #tpu.dimension_semantics<parallel>, #tpu.dimension_semantics<arbitrary>], iteration_bounds = array<i64: 1, 1, 1>, scalar_prefetch = 0 : i64, scratch_operands = 1 : i64, tpu.core_type = #tpu.core_type<tc>, window_params = [{transform_indices = @transform_0, window_bounds = array<i64: 16, 128>}, {transform_indices = @transform_1, window_bounds = array<i64: 128, 128>}, {transform_indices = @transform_2, window_bounds = array<i64: 16, 128>}]} {
    %c0_i32 = arith.constant 0 : i32
    %0 = arith.cmpi eq, %arg2, %c0_i32 : i32
    %1 = arith.extui %0 : i1 to i32
    %c0_i32_0 = arith.constant 0 : i32
    %2 = arith.cmpi ne, %1, %c0_i32_0 : i32
    scf.if %2 {
      %cst_10 = arith.constant 0.000000e+00 : f32
      %14 = vector.broadcast %cst_10 : f32 to vector<16x128xf32>
      %c0_11 = arith.constant 0 : index
      %c0_12 = arith.constant 0 : index
      %15 = vector.load %arg6[%c0_11, %c0_12] : memref<16x128xf32, #tpu.memory_space<vmem>>, vector<16x128xf32>
      tpu.vector_store %arg6[%c0_11, %c0_12], %14 {strides = array<i32>} : memref<16x128xf32, #tpu.memory_space<vmem>>, vector<16x128xf32>,
    } else {
    }
    %c0 = arith.constant 0 : index
    %c0_1 = arith.constant 0 : index
    %3 = vector.load %arg3[%c0, %c0_1] : memref<16x128xf32, #tpu.memory_space<vmem>>, vector<16x128xf32>
    %4 = arith.truncf %3 : vector<16x128xf32> to vector<16x128xbf16>
    %c0_2 = arith.constant 0 : index
    %c0_3 = arith.constant 0 : index
    %5 = vector.load %arg4[%c0_2, %c0_3] : memref<128x128xf32, #tpu.memory_space<vmem>>, vector<128x128xf32>
    %6 = arith.truncf %5 : vector<128x128xf32> to vector<128x128xbf16>
    %c0_4 = arith.constant 0 : index
    %c0_5 = arith.constant 0 : index
    %7 = vector.load %arg6[%c0_4, %c0_5] : memref<16x128xf32, #tpu.memory_space<vmem>>, vector<16x128xf32>
    %cst = arith.constant dense<0.000000e+00> : vector<16x128xf32>
    %8 = tpu.matmul %4, %6, %cst {dimension_numbers = #tpu.dot_dimension_numbers<[1], [1], [0], [0], [0, 0, 1, 0], [], []>} : vector<16x128xbf16>, vector<128x128xbf16>, vector<16x128xf32> -> vector<16x128xf32>
    %9 = arith.addf %7, %8 : vector<16x128xf32>
    %c0_6 = arith.constant 0 : index
    %c0_7 = arith.constant 0 : index
    %10 = vector.load %arg6[%c0_6, %c0_7] : memref<16x128xf32, #tpu.memory_space<vmem>>, vector<16x128xf32>
    tpu.vector_store %arg6[%c0_6, %c0_7], %9 {strides = array<i32>} : memref<16x128xf32, #tpu.memory_space<vmem>>, vector<16x128xf32>,
    %c0_i32_8 = arith.constant 0 : i32
    %11 = arith.cmpi eq, %arg2, %c0_i32_8 : i32
    %12 = arith.extui %11 : i1 to i32
    %c0_i32_9 = arith.constant 0 : i32
    %13 = arith.cmpi ne, %12, %c0_i32_9 : i32
    scf.if %13 {
      %c0_10 = arith.constant 0 : index
      %c0_11 = arith.constant 0 : index
      %14 = vector.load %arg6[%c0_10, %c0_11] : memref<16x128xf32, #tpu.memory_space<vmem>>, vector<16x128xf32>
      %c0_12 = arith.constant 0 : index
      %c0_13 = arith.constant 0 : index
      %15 = vector.load %arg5[%c0_12, %c0_13] : memref<16x128xf32, #tpu.memory_space<vmem>>, vector<16x128xf32>
      tpu.vector_store %arg5[%c0_12, %c0_13], %14 {strides = array<i32>} : memref<16x128xf32, #tpu.memory_space<vmem>>, vector<16x128xf32>,
    } else {
    }
    return
  }
  func.func @transform_0(%arg0: i32, %arg1: i32, %arg2: i32) -> (i32, i32) {
    %c0_i32 = arith.constant 0 : i32
    return %arg0, %arg2 : i32, i32
  }
  func.func @transform_1(%arg0: i32, %arg1: i32, %arg2: i32) -> (i32, i32) {
    %c0_i32 = arith.constant 0 : i32
    return %arg1, %arg2 : i32, i32
  }
  func.func @transform_2(%arg0: i32, %arg1: i32, %arg2: i32) -> (i32, i32) {
    %c0_i32 = arith.constant 0 : i32
    return %arg0, %arg1 : i32, i32
  }
}

</mosaic_0001>

<bundles_post_ra>
// kernel: transformer_forward.44
= control target key start
LH: loop header
LB: loop body
LE: loop exit
PB: predicated region body
PF: predicated region fallthrough
CT: control target
= control target key end

     0   :  { %s578_s15 = smov 0   ;;  %s632_s0 = inlined_call_operand.vmem [shape: f32[2,8,384], index: 0, kind: input, shape index: {}, may-alias: {0,1,2}]   ;;  %s633_s1 = inlined_call_operand.vmem [shape: f32[2,8,384], index: 1, kind: input, shape index: {}, may-alias: {0,1,2}]   ;;  %s634_s2 = inlined_call_operand.vmem [shape: f32[2,8,384], index: 2, kind: input, shape index: {}, may-alias: {0,1,2}]   ;;  %s635_s3 = inlined_call_operand.vmem [shape: s32[2,8,8], index: 3, kind: input, shape index: {}]   ;;  %s636_s4 = inlined_call_operand.vmem [shape: f32[2,8,128], index: 4, kind: output, shape index: {}]  }
   0x1 LB: > { %s504_s16 = sadd.s32 4294967295, %s549_s15   ;;  %p508_p0 = scmp.ge.s32.totalorder %s549_s15, 1  ;;  %s549_s15 = sphi %s578_s15, %s14_s15  }
   0x2   : > { %p193_p1 = scmp.lt.s32.totalorder %s549_s15, 3 }
   0x4   : > { %p194_p2 = pnand %p508_p0, %p193_p1 }
   0x5   : > { %p234_p3 = scmp.lt.s32.totalorder (!%p194_p2), %s504_s16, 1  ;;  %s551_s21 = smov (!%p194_p2), 64  }
   0x6   : > { %197 = sbr.rel (%p194_p2) target bundleno = 778 (0x30a), region = 36 }
   0xb   : > { %s638_s16 = smov (!%p234_p3, %s504_s16), 1  ;;  %vm265_vm0 = vcmask 523264   ;;  %v552_v6 = vmov -1e+09   ;;  %vm294_vm2 = vcmask 64512  }
   0xc   : > { %s589_s17 = smul.u32 24, %s638_s16  ;;  %s512_s25 = sshll.u32 %s638_s16, 3 }
   0xd   : > { %s254_s28 = scalar_lea.vmem %s635_s3, %s512_s25  ;;  %s258_s8 = scalar_lea.vmem %s636_s4, %s512_s25 }
   0xe   : > { %s452_s20 = scalar_lea.vmem %s633_s1, %s589_s17  ;;  %s238_s24 = scalar_lea.vmem %s632_s0, %s589_s17  ;;  %v259_v4 = vld [vmem:[%s254_s28] sm:$0xff] }
   0xf   : > { %v514_v0 = vld [vmem:[%s452_s20 + $0x8] sm:$0xff]  ;;  %v262_v1 = vld [vmem:[%s238_s24] sm:$0xff]  ;;  %vm260_vm1 = vcmp.gt.s32.totalorder %v259_v4, 0  ;;  %s456_s5 = scalar_lea.vmem %s634_s2, %s589_s17 }
  0x10   : > { %331 = vrot.lane.b32.xlu0 %v514_v0, %s551_s21  ;;  %516 = vmatpush.xpose.msk.msra.mxu0 %vm265_vm0, %v514_v0  ;;  %v261_v7 = vsel %vm260_vm1, 0.0, %v552_v6  ;;  %v515_v15 = vld [vmem:[%s456_s5 + $0x10] sm:$0xff] }
  0x11   : > { %324 = vmatpush.msra.mxu1 %v515_v15 }
  0x13   : > { %517 = vmatmul.msk.f32.vlgmr.msra.gmra.mxu0 %vm265_vm0, %v262_v1 }
  0x18   : > { %329 = vrot.lane.b32.xlu0 %v262_v1, %s551_s21 }
  0x82   : > { %v332_v2 = vpop.permute.xlu0 %331 }
  0x83   : > { %519 = vmatpush.xpose.msk.msra.mxu2 %vm265_vm0, %v332_v2 }
  0x8a   : > { %v330_v3 = vpop.permute.xlu0 %329 }
  0x8b   : > { %520 = vmatmul.msk.f32.vlgmr.msra.gmra.mxu2 %vm265_vm0, %v330_v3 }
  0x90   : > { %v289_v8 = vpop.f32.mrf.mxu0 }
  0x91   : > { %v292_v11 = vmul.f32 0.25, %v289_v8 }
  0x93   : > { %v293_v13 = vadd.f32 %v292_v11, %v261_v7 }
  0x95   : > { %v295_v14 = vsel %vm294_vm2, %v293_v13, -inf }
 0x10e   : > { %v354_v5 = vpop.f32.mrf.mxu2 }
 0x10f   : > { %v357_v9 = vmul.f32 0.25, %v354_v5 }
 0x111   : > { %v358_v10 = vadd.f32 %v357_v9, %v261_v7 }
 0x113   : > { %v359_v12 = vsel %vm294_vm2, %v358_v10, -inf }
 0x114   : > { %360 = vmax.xlane.f32.xlu1 %v359_v12 }
 0x11c   : > { %296 = vmax.xlane.f32.xlu1 %v295_v14 }
 0x187   : > { %v361_v16 = vpop.xlane.xlu1 %360 }
 0x188   : > { %v362_v17 = vsub.f32 %v358_v10, %v361_v16 }
 0x18a   : > { %v363_v18 = vmul.f32 1.442695, %v362_v17 }
 0x18c   : > { %535 = vpow2.f32 %v363_v18 }
 0x18f   : > { %v297_v19 = vpop.xlane.xlu1 %296 }
 0x190   : > { %v298_v20 = vsub.f32 %v293_v13, %v297_v19 }
 0x192   : > { %v536_v21 = vpop.eup %535  ;;  %v299_v22 = vmul.f32 1.442695, %v298_v20 }
 0x193   : > { %v365_v23 = vsel %vm294_vm2, %v536_v21, 0.0 }
 0x194   : > { %537 = vpow2.f32 %v299_v22  ;;  %366 = vadd.xlane.f32.xlu2 %v365_v23 }
 0x19a   : > { %v538_v24 = vpop.eup %537 }
 0x19b   : > { %v301_v25 = vsel %vm294_vm2, %v538_v24, 0.0 }
 0x19c   : > { %302 = vadd.xlane.f32.xlu0 %v301_v25 }
 0x1ac   : > { %371 = vrot.lane.b32.xlu2 %v515_v15, %s551_s21 }
 0x207   : > { %v367_v26 = vpop.xlane.xlu2 %366 }
 0x208   : > { %539 = vrcp.f32 %v367_v26 }
 0x20e   : > { %v540_v27 = vpop.eup %539 }
 0x20f   : > { %v372_v28 = vpop.permute.xlu2 %371  ;;  %v303_v29 = vpop.xlane.xlu0 %302  ;;  %v369_v30 = vmul.f32 %v540_v27, %v536_v21 }
 0x210   : > { %541 = vrcp.f32 %v303_v29  ;;  %392 = vmatpush.msra.mxu3 %v372_v28 }
 0x211   : > { %521 = vmatmul.msk.f32.vlgmr.msra.gmra.mxu3 %vm294_vm2, %v369_v30 }
 0x216   : > { %v542_v31 = vpop.eup %541 }
 0x217   : > { %v305_v32 = vmul.f32 %v542_v31, %v538_v24 }
 0x219   : > { %518 = vmatmul.msk.f32.vlgmr.msra.gmra.mxu1 %vm294_vm2, %v305_v32 }
 0x294   : > { %v394_v33 = vpop.f32.mrf.mxu3 }
 0x295   : > { %398 = vrot.lane.b32.xlu1 %v394_v33, %s551_s21 }
 0x296   : > { %v326_v34 = vpop.f32.mrf.mxu1 }
 0x307   : > { %v399_v35 = vpop.permute.xlu1 %398 }
 0x308   : > { %v401_v36 = vsel %vm265_vm0, %v326_v34, %v399_v35 }
 0x309   : > { %402 = vst [vmem:[%s258_s8] sm:$0xff] %v401_v36 }
 0x30a PF: > { %s14_s15 = sadd.s32 1, %s549_s15  }
 0x30b   : > { %p11_p4 = scmp.ge.s32.totalorder %s14_s15, 4  }
 0x30d   :  { %13 = sbr.rel (!%p11_p4) target bundleno = 1 (0x1), region = 75 }

// kernel: transformer_forward.45
= control target key start
LH: loop header
LB: loop body
LE: loop exit
PB: predicated region body
PF: predicated region fallthrough
CT: control target
= control target key end

     0   :  { %10 = vsyncpa [#allocation4], 0  ;;  %s276_s21 = smov [#allocation3]   ;;  %s277_s23 = smov 64   ;;  %s336_s0 = inlined_call_operand.vmem [shape: f32[16,128], index: 0, kind: input, shape index: {}]   ;;  %s337_s1 = inlined_call_operand.hbm [shape: bf16[128,128], index: 1, kind: input, shape index: {}]   ;;  %s338_s2 = inlined_call_operand.vmem [shape: f32[16,128], index: 2, kind: input, shape index: {}]   ;;  %s339_s3 = inlined_call_operand.vmem [shape: f32[1,128], index: 3, kind: input, shape index: {}]   ;;  %s340_s4 = inlined_call_operand.vmem [shape: f32[1,128], index: 4, kind: input, shape index: {}]   ;;  %s341_s5 = inlined_call_operand.vmem [shape: f32[16,128], index: 5, kind: output, shape index: {}]  }
   0x1   :  { %s17_s20 = sshll.u32 %s337_s1, 4  ;;  %s19_s22 = sshll.u32 %s276_s21, 4  ;;  %s18_s20 = int_to_ptr.hbm [resolvable:$true] %s17_s20  ;;  %s20_s22 = int_to_ptr.vmem [resolvable:$true] %s19_s22 }
   0x2   :  { %s278_s24 = smov 4  }
   0x3   :  { %25 = dma.hbm_to_vmem [thread:$0]  %s18_s20, 1024, %s20_s22, [#allocation4], %s277_s23, %s277_s23, %s278_s24  }
   0x4   :  { %274 = dma.done.wait [#allocation4], 1024  }
   0x5   :  { %275 = vsyncadd [#allocation4], 4294966272  ;;  %v240_v0 = vld [vmem:[#allocation3 + $0x38] sm:$0xff]  ;;  %v239_v1 = vld [vmem:[#allocation3 + $0x30] sm:$0xff] }
   0x6   :  { %111 = vmatpush.bf16.msra.mxu0 %v240_v0  ;;  %v238_v2 = vld [vmem:[#allocation3 + $0x28] sm:$0xff]  ;;  %v237_v3 = vld [vmem:[#allocation3 + $0x20] sm:$0xff]  ;;  %v236_v4 = vld [vmem:[#allocation3 + $0x18] sm:$0xff] }
   0x7   :  { %v235_v5 = vld [vmem:[#allocation3 + $0x10] sm:$0xff]  ;;  %v234_v6 = vld [vmem:[#allocation3 + $0x8] sm:$0xff]  ;;  %v233_v7 = vld [vmem:[#allocation3] sm:$0xff] }
   0x8   :  { %v42_v8 = vld [vmem:[%s336_s0] sm:$0xff]  ;;  %v43_v9 = vld [vmem:[%s336_s0 + $0x8] sm:$0xff] }
   0x9   :  { %v44_v10 = vpack.c.bf16 %v43_v9, %v42_v8  ;;  %v134_v11 = vld [vmem:[%s338_s2] sm:$0xff]  ;;  %v135_v15 = vld [vmem:[%s338_s2 + $0x8] sm:$0xff] }
   0xa   :  { %112 = vmatpush.bf16.msra.mxu0 %v239_v1  ;;  %v244_v42 = vld [vmem:[%s339_s3] ss:$0 sm:$0xff] }
   0xb   :  { %v245_v45 = vld [vmem:[%s340_s4] ss:$0 sm:$0xff] }
   0xe   :  { %113 = vmatpush.bf16.msra.mxu0 %v238_v2 }
  0x12   :  { %114 = vmatpush.bf16.msra.mxu0 %v237_v3 }
  0x16   :  { %115 = vmatpush.bf16.msra.mxu0 %v236_v4 }
  0x1a   :  { %116 = vmatpush.bf16.msra.mxu0 %v235_v5 }
  0x1e   :  { %117 = vmatpush.bf16.msra.mxu0 %v234_v6 }
  0x22   :  { %118 = vmatpush.bf16.msra.mxu0 %v233_v7 }
  0x25   :  { %119 = vmatmul.bf16.vlgmr.msra.gmra.mxu0 %v44_v10 }
  0xa2   :  { %v120_v12 = vpop.f32.mrf.mxu0 }
  0xa3   :  { %v136_v13 = vadd.f32 %v134_v11, %v120_v12 }
  0xa5   :  { %138 = vadd.xlane.f32.xlu0 %v136_v13  ;;  %v144_v14 = vmul.f32 %v136_v13, %v136_v13 }
  0xa7   :  { %146 = vadd.xlane.f32.xlu1 %v144_v14 }
  0xaa   :  { %v122_v16 = vpop.f32.mrf.mxu0 }
  0xab   :  { %v137_v17 = vadd.f32 %v135_v15, %v122_v16 }
  0xad   :  { %140 = vadd.xlane.f32.xlu0 %v137_v17  ;;  %v145_v18 = vmul.f32 %v137_v17, %v137_v17 }
  0xaf   :  { %148 = vadd.xlane.f32.xlu1 %v145_v18 }
 0x118   :  { %v139_v19 = vpop.xlane.xlu0 %138 }
 0x119   :  { %v142_v20 = vmul.f32 0.03125, %v139_v19 }
 0x11a   :  { %v147_v21 = vpop.xlane.xlu1 %146 }
 0x11b   :  { %v152_v22 = vmul.f32 %v142_v20, %v142_v20  ;;  %v150_v23 = vmul.f32 0.03125, %v147_v21  ;;  %v156_v41 = vsub.f32 %v136_v13, %v142_v20 }
 0x11d   :  { %v154_v24 = vsub.f32 %v150_v23, %v152_v22 }
 0x11f   :  { %v158_v25 = vadd.f32 1e-06, %v154_v24 }
 0x120   :  { %v141_v26 = vpop.xlane.xlu0 %140 }
 0x121   :  { %246 = vrsqrt.f32 %v158_v25  ;;  %v143_v27 = vmul.f32 0.03125, %v141_v26  ;;  %vm166_vm1 = vweird.f32 %v158_v25 }
 0x122   :  { %v149_v28 = vpop.xlane.xlu1 %148 }
 0x123   :  { %v153_v29 = vmul.f32 %v143_v27, %v143_v27  ;;  %v151_v30 = vmul.f32 0.03125, %v149_v28  ;;  %v157_v52 = vsub.f32 %v137_v17, %v143_v27 }
 0x125   :  { %v155_v31 = vsub.f32 %v151_v30, %v153_v29 }
 0x127   :  { %v247_v32 = vpop.eup %246  ;;  %v159_v33 = vadd.f32 1e-06, %v155_v31 }
 0x128   :  { %v161_v34 = vmul.f32 %v247_v32, %v158_v25  ;;  %vm167_vm0 = vweird.f32 %v247_v32 }
 0x129   :  { %248 = vrsqrt.f32 %v159_v33  ;;  %vm168_vm2 = vmor %vm166_vm1, %vm167_vm0  ;;  %vm176_vm4 = vweird.f32 %v159_v33 }
 0x12a   :  { %v162_v35 = vmul.f32 %v247_v32, %v161_v34 }
 0x12c   :  { %v163_v36 = vmul.f32 0.5, %v162_v35 }
 0x12e   :  { %v164_v37 = vsub.f32 1.5, %v163_v36 }
 0x12f   :  { %v249_v38 = vpop.eup %248 }
 0x130   :  { %v165_v39 = vmul.f32 %v247_v32, %v164_v37  ;;  %v171_v40 = vmul.f32 %v249_v38, %v159_v33  ;;  %vm177_vm3 = vweird.f32 %v249_v38 }
 0x131   :  { %vm178_vm5 = vmor %vm176_vm4, %vm177_vm3 }
 0x132   :  { %v169_v43 = vsel %vm168_vm2, %v247_v32, %v165_v39  ;;  %v172_v44 = vmul.f32 %v249_v38, %v171_v40 }
 0x133   :  { %v180_v46 = vmul.f32 %v169_v43, %v156_v41 }
 0x134   :  { %v173_v47 = vmul.f32 0.5, %v172_v44 }
 0x135   :  { %v186_v48 = vmul.f32 %v244_v42, %v180_v46 }
 0x136   :  { %v174_v49 = vsub.f32 1.5, %v173_v47 }
 0x137   :  { %v192_v50 = vadd.f32 %v245_v45, %v186_v48 }
 0x138   :  { %v175_v51 = vmul.f32 %v249_v38, %v174_v49 }
 0x139   :  { %194 = vst [vmem:[%s341_s5] sm:$0xff] %v192_v50 }
 0x13a   :  { %v179_v53 = vsel %vm178_vm5, %v249_v38, %v175_v51 }
 0x13b   :  { %v181_v54 = vmul.f32 %v179_v53, %v157_v52 }
 0x13d   :  { %v187_v55 = vmul.f32 %v244_v42, %v181_v54 }
 0x13f   :  { %v193_v56 = vadd.f32 %v245_v45, %v187_v55 }
 0x141   :  { %195 = vst [vmem:[%s341_s5 + $0x8] sm:$0xff] %v193_v56 }
 0x142   :  { %200 = vsyncpa [#allocation4], 1 }

// kernel: transformer_forward.31
= control target key start
LH: loop header
LB: loop body
LE: loop exit
PB: predicated region body
PF: predicated region fallthrough
CT: control target
= control target key end

     0   :  { %s337_s15 = smov 0   ;;  %s370_s0 = inlined_call_operand.vmem [shape: f32[2,8,128], index: 0, kind: input, shape index: {}]   ;;  %s371_s1 = inlined_call_operand.vmem [shape: f32[16,128], index: 1, kind: input, shape index: {}]   ;;  %s372_s2 = inlined_call_operand.vmem [shape: f32[1,128], index: 2, kind: input, shape index: {}]   ;;  %s373_s3 = inlined_call_operand.vmem [shape: f32[1,128], index: 3, kind: input, shape index: {}]   ;;  %s374_s4 = inlined_call_operand.vmem [shape: f32[2,8,128], index: 4, kind: output, shape index: {}]  }
   0x1 LB: > { %s283_s16 = sadd.s32 4294967295, %s310_s15   ;;  %p287_p0 = scmp.ge.s32.totalorder %s310_s15, 1  ;;  %s310_s15 = sphi %s337_s15, %s14_s15  }
   0x2   : > { %p161_p1 = scmp.lt.s32.totalorder %s310_s15, 3 }
   0x4   : > { %p162_p2 = pnand %p287_p0, %p161_p1 }
   0x5   : > { %p185_p3 = scmp.lt.s32.totalorder (!%p162_p2), %s283_s16, 1 }
   0x6   : > { %165 = sbr.rel (%p162_p2) target bundleno = 174 (0xae), region = 36 }
   0xb   : > { %s376_s16 = smov (!%p185_p3, %s283_s16), 1  ;;  %v195_v1 = vld [vmem:[%s371_s1] sm:$0xff] }
   0xc   : > { %s288_s17 = sshll.u32 %s376_s16, 3  ;;  %v300_v19 = vld [vmem:[%s372_s2] ss:$0 sm:$0xff] }
   0xd   : > { %s188_s20 = scalar_lea.vmem %s370_s0, %s288_s17  ;;  %v301_v21 = vld [vmem:[%s373_s3] ss:$0 sm:$0xff]  ;;  %s192_s29 = scalar_lea.vmem %s374_s4, %s288_s17 }
   0xe   : > { %v193_v0 = vld [vmem:[%s188_s20] sm:$0xff] }
   0xf   : > { %v194_v2 = vmul.f32 5.656854, %v193_v0 }
  0x11   : > { %v196_v3 = vadd.f32 %v195_v1, %v194_v2 }
  0x13   : > { %197 = vadd.xlane.f32.xlu0 %v196_v3  ;;  %v200_v4 = vmul.f32 %v196_v3, %v196_v3 }
  0x1b   : > { %201 = vadd.xlane.f32.xlu0 %v200_v4 }
  0x86   : > { %v198_v5 = vpop.xlane.xlu0 %197 }
  0x87   : > { %v199_v6 = vmul.f32 0.03125, %v198_v5 }
  0x89   : > { %v204_v8 = vmul.f32 %v199_v6, %v199_v6  ;;  %v206_v18 = vsub.f32 %v196_v3, %v199_v6 }
  0x8e   : > { %v202_v7 = vpop.xlane.xlu0 %201 }
  0x8f   : > { %v203_v9 = vmul.f32 0.03125, %v202_v7 }
  0x91   : > { %v205_v10 = vsub.f32 %v203_v9, %v204_v8 }
  0x93   : > { %v207_v11 = vadd.f32 1e-06, %v205_v10 }
  0x95   : > { %302 = vrsqrt.f32 %v207_v11  ;;  %vm214_vm1 = vweird.f32 %v207_v11 }
  0x9b   : > { %v303_v12 = vpop.eup %302 }
  0x9c   : > { %v209_v13 = vmul.f32 %v303_v12, %v207_v11  ;;  %vm215_vm0 = vweird.f32 %v303_v12 }
  0x9d   : > { %vm216_vm2 = vmor %vm214_vm1, %vm215_vm0 }
  0x9e   : > { %v210_v14 = vmul.f32 %v303_v12, %v209_v13 }
  0xa0   : > { %v211_v15 = vmul.f32 0.5, %v210_v14 }
  0xa2   : > { %v212_v16 = vsub.f32 1.5, %v211_v15 }
  0xa4   : > { %v213_v17 = vmul.f32 %v303_v12, %v212_v16 }
  0xa6   : > { %v217_v20 = vsel %vm216_vm2, %v303_v12, %v213_v17 }
  0xa7   : > { %v218_v22 = vmul.f32 %v217_v20, %v206_v18 }
  0xa9   : > { %v223_v23 = vmul.f32 %v300_v19, %v218_v22 }
  0xab   : > { %v228_v24 = vadd.f32 %v301_v21, %v223_v23 }
  0xad   : > { %229 = vst [vmem:[%s192_s29] sm:$0xff] %v228_v24 }
  0xae PF: > { %s14_s15 = sadd.s32 1, %s310_s15  }
  0xaf   : > { %p11_p4 = scmp.ge.s32.totalorder %s14_s15, 4  }
  0xb1   :  { %13 = sbr.rel (!%p11_p4) target bundleno = 1 (0x1), region = 66 }

// kernel: transformer_forward.43
= control target key start
LH: loop header
LB: loop body
LE: loop exit
PB: predicated region body
PF: predicated region fallthrough
CT: control target
= control target key end

     0   :  { %s690_s9 = smov 0   ;;  %s692_s10 = smov 0   ;;  %s786_s0 = inlined_call_operand.vmem [shape: f32[16,128], index: 0, kind: input, shape index: {}]   ;;  %s787_s1 = inlined_call_operand.vmem [shape: bf16[128,384], index: 1, kind: input, shape index: {}]   ;;  %s788_s2 = inlined_call_operand.vmem [shape: f32[16,384], index: 2, kind: output, shape index: {}]  }
   0x1   :  { %s694_s11 = smov 0   ;;  %s696_s12 = smov 0  }
   0x2   :  { %s698_s13 = smov 0  }
   0x3 LB: > { %s27_s14 = sadd.s32 1, %s669_s12  ;;  %s541_s15 = sadd.s32 4294967295, %s673_s13   ;;  %s673_s13 = sphi %s698_s13, %s12_s13   ;;  %s669_s12 = sphi %s696_s12, %s793_s12   ;;  %s665_s11 = sphi %s694_s11, %s792_s11   ;;  %s661_s10 = sphi %s692_s10, %s791_s10   ;;  %s657_s9 = sphi %s690_s9, %s790_s9  }
   0x4   : > { %p29_p0 = scmp.ge.s32.totalorder %s27_s14, 3  ;;  %p75_p1 = scmp.ne.s32.totalorder %s661_s10, %s657_s9 }
   0x5   : > { %p76_p2 = scmp.eq.s32.totalorder %s673_s13, 0  ;;  %p107_p4 = scmp.eq.s32.totalorder %s541_s15, 2 }
   0x6   : > { %s795_s14 = smov (%p29_p0, %s27_s14), 0  ;;  %s68_s17 = sadd.s32 1, %s661_s10 }
   0x7   : > { %p77_p3 = por %p76_p2, %p75_p1  ;;  %s64_s16 = ssub.s32 %s669_s12, %s795_s14 }
   0x8   : > { %p66_p5 = scmp.eq.s32.totalorder %s64_s16, 0  ;;  %p725_p6 = por %p107_p4, %p75_p1 }
   0x9   : > { %p545_p7 = scmp.ge.s32.totalorder %s673_s13, 3 }
   0xa   : > { %s730_s19 = scalar_select %p66_p5, %s661_s10, %s68_s17  }
   0xb   : > { %141 = sbr.rel (%p545_p7) target bundleno = 36 (0x24), region = 20 }
  0x10   : > { %144 = sbr.rel (!%p77_p3) target bundleno = 36 (0x24), region = 24  ;;  %s146_s20 = sand.u32 (%p77_p3), 1, %s661_s10  }
  0x11   : > { %s547_s21 = sshll.u32 (%p77_p3), %s669_s12, 2  ;;  %s546_s22 = sshll.u32 (%p77_p3), %s146_s20, 6 }
  0x12   : > { %s738_s25 = scalar_lea.vmem (%p77_p3), %s787_s1, %s547_s21  ;;  %s148_s26 = scalar_lea.vmem (%p77_p3), [#allocation3], %s546_s22 }
  0x13   : > { %v170_v0 = vld [vmem:[%s738_s25] sm:$0xf] (%p77_p3)  ;;  %v172_v1 = vld [vmem:[%s738_s25 + $0xc] sm:$0xf] (%p77_p3)  ;;  %v174_v2 = vld [vmem:[%s738_s25 + $0x18] sm:$0xf] (%p77_p3) }
  0x14   : > { %171 = vst [vmem:[%s148_s26] sm:$0xf] (%p77_p3), %v170_v0  ;;  %v176_v3 = vld [vmem:[%s738_s25 + $0x24] sm:$0xf] (%p77_p3)  ;;  %v178_v4 = vld [vmem:[%s738_s25 + $0x30] sm:$0xf] (%p77_p3) }
  0x15   : > { %173 = vst [vmem:[%s148_s26 + $0x4] sm:$0xf] %v172_v1  ;;  %v180_v5 = vld [vmem:[%s738_s25 + $0x3c] sm:$0xf]  ;;  %v182_v6 = vld [vmem:[%s738_s25 + $0x48] sm:$0xf] }
  0x16   : > { %175 = vst [vmem:[%s148_s26 + $0x8] sm:$0xf] %v174_v2  ;;  %v184_v7 = vld [vmem:[%s738_s25 + $0x54] sm:$0xf]  ;;  %v186_v8 = vld [vmem:[%s738_s25 + $0x60] sm:$0xf] }
  0x17   : > { %177 = vst [vmem:[%s148_s26 + $0xc] sm:$0xf] %v176_v3  ;;  %v188_v9 = vld [vmem:[%s738_s25 + $0x6c] sm:$0xf]  ;;  %v190_v10 = vld [vmem:[%s738_s25 + $0x78] sm:$0xf] }
  0x18   : > { %179 = vst [vmem:[%s148_s26 + $0x10] sm:$0xf] %v178_v4  ;;  %v192_v11 = vld [vmem:[%s738_s25 + $0x84] sm:$0xf]  ;;  %v194_v12 = vld [vmem:[%s738_s25 + $0x90] sm:$0xf] }
  0x19   : > { %181 = vst [vmem:[%s148_s26 + $0x14] sm:$0xf] %v180_v5  ;;  %v196_v13 = vld [vmem:[%s738_s25 + $0x9c] sm:$0xf]  ;;  %v198_v14 = vld [vmem:[%s738_s25 + $0xa8] sm:$0xf] }
  0x1a   : > { %183 = vst [vmem:[%s148_s26 + $0x18] sm:$0xf] %v182_v6  ;;  %v200_v15 = vld [vmem:[%s738_s25 + $0xb4] sm:$0xf] }
  0x1b   : > { %185 = vst [vmem:[%s148_s26 + $0x1c] sm:$0xf] %v184_v7 }
  0x1c   : > { %187 = vst [vmem:[%s148_s26 + $0x20] sm:$0xf] %v186_v8 }
  0x1d   : > { %189 = vst [vmem:[%s148_s26 + $0x24] sm:$0xf] %v188_v9 }
  0x1e   : > { %191 = vst [vmem:[%s148_s26 + $0x28] sm:$0xf] %v190_v10 }
  0x1f   : > { %193 = vst [vmem:[%s148_s26 + $0x2c] sm:$0xf] %v192_v11 }
  0x20   : > { %195 = vst [vmem:[%s148_s26 + $0x30] sm:$0xf] %v194_v12 }
  0x21   : > { %197 = vst [vmem:[%s148_s26 + $0x34] sm:$0xf] %v196_v13 }
  0x22   : > { %199 = vst [vmem:[%s148_s26 + $0x38] sm:$0xf] %v198_v14 }
  0x23   : > { %201 = vst [vmem:[%s148_s26 + $0x3c] sm:$0xf] %v200_v15 }
  0x24 PF: > { %p548_p8 = scmp.ge.s32.totalorder %s673_s13, 1  ;;  %p256_p9 = scmp.lt.s32.totalorder %s673_s13, 4 }
  0x26   : > { %p257_p10 = pnand %p548_p8, %p256_p9 }
  0x27   : > { %s263_s27 = sand.u32 (!%p257_p10), 1, %s657_s9  }
  0x28   : > { %260 = sbr.rel (%p257_p10) target bundleno = 220 (0xdc), region = 65  ;;  %s549_s28 = sshll.u32 (!%p257_p10), %s263_s27, 6 }
  0x29   : > { %s265_s29 = scalar_lea.vmem (!%p257_p10), [#allocation3], %s549_s28  ;;  %s550_s6 = sshll.u32 (!%p257_p10), %s263_s27, 4 }
  0x2a   : > { %s290_s7 = scalar_lea.vmem (!%p257_p10), [#allocation4], %s550_s6 }
  0x2d   : > { %v594_v16 = vld [vmem:[%s265_s29 + $0x38] sm:$0xff]  ;;  %v593_v17 = vld [vmem:[%s265_s29 + $0x30] sm:$0xff]  ;;  %v592_v18 = vld [vmem:[%s265_s29 + $0x28] sm:$0xff]  ;;  %s584_s8 = sshll.u32 (%p725_p6), %s665_s11, 3 }
  0x2e   : > { %377 = vmatpush.bf16.msra.mxu0 %v594_v16  ;;  %v591_v19 = vld [vmem:[%s265_s29 + $0x20] sm:$0xff]  ;;  %v590_v20 = vld [vmem:[%s265_s29 + $0x18] sm:$0xff]  ;;  %v589_v21 = vld [vmem:[%s265_s29 + $0x10] sm:$0xff]  ;;  %s413_s16 = scalar_lea.vmem (%p725_p6), %s788_s2, %s584_s8 }
  0x2f   : > { %v588_v22 = vld [vmem:[%s265_s29 + $0x8] sm:$0xff]  ;;  %v587_v23 = vld [vmem:[%s265_s29] sm:$0xff] }
  0x30   : > { %v308_v24 = vld [vmem:[%s786_s0] sm:$0xff]  ;;  %v309_v25 = vld [vmem:[%s786_s0 + $0x8] sm:$0xff] }
  0x31   : > { %v310_v26 = vpack.c.bf16 %v309_v25, %v308_v24 }
  0x32   : > { %378 = vmatpush.bf16.msra.mxu0 %v593_v17 }
  0x36   : > { %379 = vmatpush.bf16.msra.mxu0 %v592_v18 }
  0x3a   : > { %380 = vmatpush.bf16.msra.mxu0 %v591_v19 }
  0x3e   : > { %381 = vmatpush.bf16.msra.mxu0 %v590_v20 }
  0x42   : > { %382 = vmatpush.bf16.msra.mxu0 %v589_v21 }
  0x46   : > { %383 = vmatpush.bf16.msra.mxu0 %v588_v22 }
  0x4a   : > { %384 = vmatpush.bf16.msra.mxu0 %v587_v23 }
  0x4d   : > { %385 = vmatmul.bf16.vlgmr.msra.gmra.mxu0 %v310_v26 }
  0xca   : > { %v386_v27 = vpop.f32.mrf.mxu0 }
  0xcb   : > { %400 = vst [vmem:[%s290_s7] sm:$0xff] %v386_v27 }
  0xcf   : > { %408 = sbr.rel (!%p725_p6) target bundleno = 220 (0xdc), region = 81 }
  0xd2   : > { %v388_v28 = vpop.f32.mrf.mxu0  ;;  %v444_v29 = vld [vmem:[%s290_s7] sm:$0xff] (%p725_p6) }
  0xd3   : > { %401 = vst [vmem:[%s290_s7 + $0x8] sm:$0xff] %v388_v28 }
  0xd4   : > { %445 = vst [vmem:[%s413_s16] sm:$0xff] %v444_v29 }
  0xda   : > { %v446_v30 = vld [vmem:[%s290_s7 + $0x8] sm:$0xff] }
  0xdb   : > { %447 = vst [vmem:[%s413_s16 + $0x18] sm:$0xff] %v446_v30 }
  0xdc PF: > { %s12_s13 = sadd.s32 1, %s673_s13   ;;  %s790_s9 = smov %s661_s10 }
  0xdd   : > { %p9_p11 = scmp.ge.s32.totalorder %s12_s13, 5   ;;  %s791_s10 = smov %s730_s19 }
  0xde   : > { %s792_s11 = smov %s669_s12  ;;  %s793_s12 = smov %s795_s14 }
  0xdf   :  { %11 = sbr.rel (!%p9_p11) target bundleno = 3 (0x3), region = 153 }

// kernel: transformer_forward.32
= control target key start
LH: loop header
LB: loop body
LE: loop exit
PB: predicated region body
PF: predicated region fallthrough
CT: control target
= control target key end

     0   :  { %7 = vsyncpa [#allocation4], 0  ;;  %s775_s0 = inlined_call_operand.vmem [shape: f32[16,128], index: 0, kind: input, shape index: {}]   ;;  %s776_s1 = inlined_call_operand.hbm [shape: bf16[128,384], index: 1, kind: input, shape index: {}]   ;;  %s777_s2 = inlined_call_operand.vmem [shape: f32[16,384], index: 2, kind: output, shape index: {}]  }
   0x1   :  { %9 = vsyncpa [#allocation4 + $0x1], 0  ;;  %s676_s9 = smov 0   ;;  %s678_s10 = smov 0  }
   0x2   :  { %s680_s11 = smov 0   ;;  %s682_s12 = smov 0  }
   0x3   :  { %s684_s13 = smov 0   ;;  %s686_s14 = smov 0  }
   0x4 LB: > { %s464_s15 = sadd.s32 4294967295, %s656_s14   ;;  %s30_s16 = sadd.s32 1, %s652_s13  ;;  %s656_s14 = sphi %s686_s14, %s15_s14   ;;  %s652_s13 = sphi %s684_s13, %s785_s13   ;;  %s648_s12 = sphi %s682_s12, %s784_s12   ;;  %s644_s11 = sphi %s680_s11, %s783_s11   ;;  %s640_s10 = sphi %s678_s10, %s782_s10   ;;  %s636_s9 = sphi %s676_s9, %s781_s9  }
   0x5   : > { %p32_p0 = scmp.ge.s32.totalorder %s30_s16, 3  ;;  %s71_s17 = sadd.s32 1, %s644_s11 }
   0x6   : > { %p78_p1 = scmp.ne.s32.totalorder %s644_s11, %s640_s10  ;;  %p79_p2 = scmp.eq.s32.totalorder %s656_s14, 0 }
   0x7   : > { %s787_s16 = smov (%p32_p0, %s30_s16), 0  ;;  %p84_p4 = scmp.ne.s32.totalorder %s640_s10, %s636_s9 }
   0x8   : > { %p712_p3 = por %p79_p2, %p78_p1  ;;  %s67_s19 = ssub.s32 %s652_s13, %s787_s16 }
   0x9   : > { %p85_p5 = scmp.eq.s32.totalorder %s464_s15, 0  ;;  %p69_p6 = scmp.eq.s32.totalorder %s67_s19, 0 }
   0xa   : > { %p110_p7 = scmp.eq.s32.totalorder %s464_s15, 2  ;;  %p524_p10 = scmp.lt.s32.totalorder %s656_s14, 3 }
   0xb   : > { %p719_p8 = por %p85_p5, %p84_p4  ;;  %s148_s23 = sand.u32 1, %s644_s11  }
   0xc   : > { %s724_s21 = scalar_select %p69_p6, %s644_s11, %s71_s17  }
   0xd   : > { %p726_p9 = por %p110_p7, %p78_p1  ;;  %s470_s24 = sshll.u32 %s652_s13, 2 }
   0xe   : > { %s469_s25 = sshll.u32 %s148_s23, 6  ;;  %s159_s28 = scalar_lea.hbm %s776_s1, %s470_s24 }
   0xf   : > { %s160_s29 = sshll.u32 %s159_s28, 4  ;;  %s152_s30 = scalar_lea.vmem [#allocation3], %s469_s25  ;;  %s161_s29 = int_to_ptr.hbm [resolvable:$true] %s160_s29 }
  0x10   : > { %s162_s3 = sshll.u32 %s152_s30, 4  ;;  %p521_p11 = pnand %p524_p10, %p712_p3  ;;  %s163_s3 = int_to_ptr.vmem [resolvable:$true] %s162_s3 }
  0x11   : > { %p471_p12 = scmp.ge.s32.totalorder %s656_s14, 1  ;;  %s149_s4 = scalar_lea.sflag [#allocation4], %s148_s23 }
  0x12   : > { %s658_s5 = smov 192   ;;  %s659_s6 = smov 64  }
  0x13   : > { %s660_s7 = smov 4   ;;  %p170_p13 = scmp.lt.s32.totalorder %s656_s14, 4 }
  0x14   : > { %523 = dma.hbm_to_vmem [thread:$0]  (!%p521_p11), %s161_s29, 1024, %s163_s3, %s149_s4, %s658_s5, %s659_s6, %s660_s7  }
  0x15   : > { %p171_p0 = pnand %p471_p12, %p170_p13 }
  0x16   : > { %s176_s8 = sand.u32 (!%p171_p0), 1, %s640_s10  }
  0x17   : > { %174 = sbr.rel (%p171_p0) target bundleno = 204 (0xcc), region = 28  ;;  %s472_s9 = sshll.u32 (!%p171_p0), %s176_s8, 6 }
  0x18   : > { %s177_s15 = scalar_lea.sflag (!%p171_p0), [#allocation4], %s176_s8  ;;  %s180_s17 = scalar_lea.vmem (!%p171_p0), [#allocation3], %s472_s9 }
  0x1c   : > { %631 = dma.done.wait (%p719_p8), %s177_s15, 1024  }
  0x1d   : > { %633 = vsyncadd (%p719_p8), %s177_s15, 4294966272  ;;  %v517_v0 = vld [vmem:[%s180_s17 + $0x38] sm:$0xff]  ;;  %v516_v1 = vld [vmem:[%s180_s17 + $0x30] sm:$0xff]  ;;  %s473_s24 = sshll.u32 %s176_s8, 4  ;;  %s507_s26 = sshll.u32 (%p726_p9), %s648_s12, 3 }
  0x1e   : > { %295 = vmatpush.bf16.msra.mxu0 %v517_v0  ;;  %v515_v2 = vld [vmem:[%s180_s17 + $0x28] sm:$0xff]  ;;  %v514_v3 = vld [vmem:[%s180_s17 + $0x20] sm:$0xff]  ;;  %v513_v4 = vld [vmem:[%s180_s17 + $0x18] sm:$0xff]  ;;  %s208_s25 = scalar_lea.vmem [#allocation5], %s473_s24  ;;  %s331_s29 = scalar_lea.vmem (%p726_p9), %s777_s2, %s507_s26 }
  0x1f   : > { %v512_v5 = vld [vmem:[%s180_s17 + $0x10] sm:$0xff]  ;;  %v511_v6 = vld [vmem:[%s180_s17 + $0x8] sm:$0xff]  ;;  %v510_v7 = vld [vmem:[%s180_s17] sm:$0xff] }
  0x20   : > { %v226_v8 = vld [vmem:[%s775_s0] sm:$0xff]  ;;  %v227_v9 = vld [vmem:[%s775_s0 + $0x8] sm:$0xff] }
  0x21   : > { %v228_v10 = vpack.c.bf16 %v227_v9, %v226_v8 }
  0x22   : > { %296 = vmatpush.bf16.msra.mxu0 %v516_v1 }
  0x26   : > { %297 = vmatpush.bf16.msra.mxu0 %v515_v2 }
  0x2a   : > { %298 = vmatpush.bf16.msra.mxu0 %v514_v3 }
  0x2e   : > { %299 = vmatpush.bf16.msra.mxu0 %v513_v4 }
  0x32   : > { %300 = vmatpush.bf16.msra.mxu0 %v512_v5 }
  0x36   : > { %301 = vmatpush.bf16.msra.mxu0 %v511_v6 }
  0x3a   : > { %302 = vmatpush.bf16.msra.mxu0 %v510_v7 }
  0x3d   : > { %303 = vmatmul.bf16.vlgmr.msra.gmra.mxu0 %v228_v10 }
  0xba   : > { %v304_v11 = vpop.f32.mrf.mxu0 }
  0xbb   : > { %318 = vst [vmem:[%s208_s25] sm:$0xff] %v304_v11 }
  0xbf   : > { %326 = sbr.rel (!%p726_p9) target bundleno = 204 (0xcc), region = 44 }
  0xc2   : > { %v306_v12 = vpop.f32.mrf.mxu0  ;;  %v362_v13 = vld [vmem:[%s208_s25] sm:$0xff] (%p726_p9) }
  0xc3   : > { %319 = vst [vmem:[%s208_s25 + $0x8] sm:$0xff] %v306_v12 }
  0xc4   : > { %363 = vst [vmem:[%s331_s29] sm:$0xff] %v362_v13 }
  0xca   : > { %v364_v14 = vld [vmem:[%s208_s25 + $0x8] sm:$0xff] }
  0xcb   : > { %365 = vst [vmem:[%s331_s29 + $0x18] sm:$0xff] %v364_v14 }
  0xcc PF: > { %s15_s14 = sadd.s32 1, %s656_s14   ;;  %s781_s9 = smov %s640_s10 }
  0xcd   : > { %p12_p1 = scmp.ge.s32.totalorder %s15_s14, 5   ;;  %s782_s10 = smov %s644_s11 }
  0xce   : > { %s783_s11 = smov %s724_s21  ;;  %s784_s12 = smov %s652_s13 }
  0xcf   : > { %s785_s13 = smov %s787_s16  ;;  %14 = sbr.rel (!%p12_p1) target bundleno = 4 (0x4), region = 117 }
  0xd4   :  { %381 = vsyncpa [#allocation4], 1 }
  0xd5   :  { %383 = vsyncpa [#allocation4 + $0x1], 1 }

// kernel: transformer_forward.46
= control target key start
LH: loop header
LB: loop body
LE: loop exit
PB: predicated region body
PF: predicated region fallthrough
CT: control target
= control target key end

     0   :  { %7 = vsyncpa [#allocation4], 0  ;;  %s201_s12 = smov [#allocation3]   ;;  %s202_s14 = smov 64   ;;  %s234_s0 = inlined_call_operand.vmem [shape: f32[16,128], index: 0, kind: input, shape index: {}]   ;;  %s235_s1 = inlined_call_operand.hbm [shape: bf16[128,128], index: 1, kind: input, shape index: {}]   ;;  %s236_s2 = inlined_call_operand.vmem [shape: f32[16,128], index: 2, kind: output, shape index: {}]  }
   0x1   :  { %s14_s11 = sshll.u32 %s235_s1, 4  ;;  %s16_s13 = sshll.u32 %s201_s12, 4  ;;  %s15_s11 = int_to_ptr.hbm [resolvable:$true] %s14_s11  ;;  %s17_s13 = int_to_ptr.vmem [resolvable:$true] %s16_s13 }
   0x2   :  { %s203_s15 = smov 4  }
   0x3   :  { %22 = dma.hbm_to_vmem [thread:$0]  %s15_s11, 1024, %s17_s13, [#allocation4], %s202_s14, %s202_s14, %s203_s15  }
   0x4   :  { %199 = dma.done.wait [#allocation4], 1024  }
   0x5   :  { %200 = vsyncadd [#allocation4], 4294966272  ;;  %v171_v0 = vld [vmem:[#allocation3 + $0x38] sm:$0xff]  ;;  %v170_v1 = vld [vmem:[#allocation3 + $0x30] sm:$0xff] }
   0x6   :  { %102 = vmatpush.bf16.msra.mxu0 %v171_v0  ;;  %v169_v2 = vld [vmem:[#allocation3 + $0x28] sm:$0xff]  ;;  %v168_v3 = vld [vmem:[#allocation3 + $0x20] sm:$0xff]  ;;  %v167_v4 = vld [vmem:[#allocation3 + $0x18] sm:$0xff] }
   0x7   :  { %v166_v5 = vld [vmem:[#allocation3 + $0x10] sm:$0xff]  ;;  %v165_v6 = vld [vmem:[#allocation3 + $0x8] sm:$0xff]  ;;  %v164_v7 = vld [vmem:[#allocation3] sm:$0xff] }
   0x8   :  { %v33_v8 = vld [vmem:[%s234_s0] sm:$0xff]  ;;  %v34_v9 = vld [vmem:[%s234_s0 + $0x8] sm:$0xff] }
   0x9   :  { %v35_v10 = vpack.c.bf16 %v34_v9, %v33_v8 }
   0xa   :  { %103 = vmatpush.bf16.msra.mxu0 %v170_v1 }
   0xe   :  { %104 = vmatpush.bf16.msra.mxu0 %v169_v2 }
  0x12   :  { %105 = vmatpush.bf16.msra.mxu0 %v168_v3 }
  0x16   :  { %106 = vmatpush.bf16.msra.mxu0 %v167_v4 }
  0x1a   :  { %107 = vmatpush.bf16.msra.mxu0 %v166_v5 }
  0x1e   :  { %108 = vmatpush.bf16.msra.mxu0 %v165_v6 }
  0x22   :  { %109 = vmatpush.bf16.msra.mxu0 %v164_v7 }
  0x25   :  { %110 = vmatmul.bf16.vlgmr.msra.gmra.mxu0 %v35_v10 }
  0xa2   :  { %v111_v11 = vpop.f32.mrf.mxu0 }
  0xa3   :  { %125 = vst [vmem:[%s236_s2] sm:$0xff] %v111_v11 }
  0xaa   :  { %v113_v12 = vpop.f32.mrf.mxu0 }
  0xab   :  { %126 = vst [vmem:[%s236_s2 + $0x8] sm:$0xff] %v113_v12 }
  0xac   :  { %131 = vsyncpa [#allocation4], 1 }

// kernel: transformer_forward.35
= control target key start
LH: loop header
LB: loop body
LE: loop exit
PB: predicated region body
PF: predicated region fallthrough
CT: control target
= control target key end

     0   :  { %8 = vsyncpa [#allocation4], 0  ;;  %s213_s15 = smov [#allocation3]   ;;  %s214_s17 = smov 64   ;;  %s254_s0 = inlined_call_operand.vmem [shape: f32[16,128], index: 0, kind: input, shape index: {}]   ;;  %s255_s1 = inlined_call_operand.hbm [shape: bf16[128,128], index: 1, kind: input, shape index: {}]   ;;  %s256_s2 = inlined_call_operand.vmem [shape: f32[1,128], index: 2, kind: input, shape index: {}]   ;;  %s257_s3 = inlined_call_operand.vmem [shape: f32[16,128], index: 3, kind: output, shape index: {}]  }
   0x1   :  { %s15_s14 = sshll.u32 %s255_s1, 4  ;;  %s17_s16 = sshll.u32 %s213_s15, 4  ;;  %s16_s14 = int_to_ptr.hbm [resolvable:$true] %s15_s14  ;;  %s18_s16 = int_to_ptr.vmem [resolvable:$true] %s17_s16 }
   0x2   :  { %s215_s18 = smov 4  }
   0x3   :  { %23 = dma.hbm_to_vmem [thread:$0]  %s16_s14, 1024, %s18_s16, [#allocation4], %s214_s17, %s214_s17, %s215_s18  }
   0x4   :  { %211 = dma.done.wait [#allocation4], 1024  }
   0x5   :  { %212 = vsyncadd [#allocation4], 4294966272  ;;  %v182_v0 = vld [vmem:[#allocation3 + $0x38] sm:$0xff]  ;;  %v181_v1 = vld [vmem:[#allocation3 + $0x30] sm:$0xff] }
   0x6   :  { %105 = vmatpush.bf16.msra.mxu0 %v182_v0  ;;  %v180_v2 = vld [vmem:[#allocation3 + $0x28] sm:$0xff]  ;;  %v179_v3 = vld [vmem:[#allocation3 + $0x20] sm:$0xff]  ;;  %v178_v4 = vld [vmem:[#allocation3 + $0x18] sm:$0xff] }
   0x7   :  { %v177_v5 = vld [vmem:[#allocation3 + $0x10] sm:$0xff]  ;;  %v176_v6 = vld [vmem:[#allocation3 + $0x8] sm:$0xff]  ;;  %v175_v7 = vld [vmem:[#allocation3] sm:$0xff] }
   0x8   :  { %v36_v8 = vld [vmem:[%s254_s0] sm:$0xff]  ;;  %v37_v9 = vld [vmem:[%s254_s0 + $0x8] sm:$0xff] }
   0x9   :  { %v38_v10 = vpack.c.bf16 %v37_v9, %v36_v8  ;;  %v186_v11 = vld [vmem:[%s256_s2] ss:$0 sm:$0xff] }
   0xa   :  { %106 = vmatpush.bf16.msra.mxu0 %v181_v1 }
   0xe   :  { %107 = vmatpush.bf16.msra.mxu0 %v180_v2 }
  0x12   :  { %108 = vmatpush.bf16.msra.mxu0 %v179_v3 }
  0x16   :  { %109 = vmatpush.bf16.msra.mxu0 %v178_v4 }
  0x1a   :  { %110 = vmatpush.bf16.msra.mxu0 %v177_v5 }
  0x1e   :  { %111 = vmatpush.bf16.msra.mxu0 %v176_v6 }
  0x22   :  { %112 = vmatpush.bf16.msra.mxu0 %v175_v7 }
  0x25   :  { %113 = vmatmul.bf16.vlgmr.msra.gmra.mxu0 %v38_v10 }
  0xa2   :  { %v114_v12 = vpop.f32.mrf.mxu0 }
  0xa3   :  { %v132_v13 = vadd.f32 %v186_v11, %v114_v12 }
  0xa5   :  { %v134_v14 = vmax.f32 %v132_v13, 0.0 }
  0xa7   :  { %136 = vst [vmem:[%s257_s3] sm:$0xff] %v134_v14 }
  0xaa   :  { %v116_v15 = vpop.f32.mrf.mxu0 }
  0xab   :  { %v133_v16 = vadd.f32 %v186_v11, %v116_v15 }
  0xad   :  { %v135_v17 = vmax.f32 %v133_v16, 0.0 }
  0xaf   :  { %137 = vst [vmem:[%s257_s3 + $0x8] sm:$0xff] %v135_v17 }
  0xb0   :  { %142 = vsyncpa [#allocation4], 1 }

// kernel: transformer_forward.36
= control target key start
LH: loop header
LB: loop body
LE: loop exit
PB: predicated region body
PF: predicated region fallthrough
CT: control target
= control target key end

     0   :  { %11 = vsyncpa [#allocation4], 0  ;;  %s286_s24 = smov [#allocation3]   ;;  %s287_s26 = smov 64   ;;  %s354_s0 = inlined_call_operand.vmem [shape: f32[16,128], index: 0, kind: input, shape index: {}]   ;;  %s355_s1 = inlined_call_operand.hbm [shape: bf16[128,128], index: 1, kind: input, shape index: {}]   ;;  %s356_s2 = inlined_call_operand.vmem [shape: f32[1,128], index: 2, kind: input, shape index: {}]   ;;  %s357_s3 = inlined_call_operand.vmem [shape: f32[16,128], index: 3, kind: input, shape index: {}]   ;;  %s358_s4 = inlined_call_operand.vmem [shape: f32[1,128], index: 4, kind: input, shape index: {}]   ;;  %s359_s5 = inlined_call_operand.vmem [shape: f32[1,128], index: 5, kind: input, shape index: {}]   ;;  %s360_s6 = inlined_call_operand.vmem [shape: f32[16,128], index: 6, kind: output, shape index: {}]  }
   0x1   :  { %s18_s23 = sshll.u32 %s355_s1, 4  ;;  %s20_s25 = sshll.u32 %s286_s24, 4  ;;  %s19_s23 = int_to_ptr.hbm [resolvable:$true] %s18_s23  ;;  %s21_s25 = int_to_ptr.vmem [resolvable:$true] %s20_s25 }
   0x2   :  { %s288_s27 = smov 4  }
   0x3   :  { %26 = dma.hbm_to_vmem [thread:$0]  %s19_s23, 1024, %s21_s25, [#allocation4], %s287_s26, %s287_s26, %s288_s27  }
   0x4   :  { %284 = dma.done.wait [#allocation4], 1024  }
   0x5   :  { %285 = vsyncadd [#allocation4], 4294966272  ;;  %v249_v0 = vld [vmem:[#allocation3 + $0x38] sm:$0xff]  ;;  %v248_v1 = vld [vmem:[#allocation3 + $0x30] sm:$0xff] }
   0x6   :  { %114 = vmatpush.bf16.msra.mxu0 %v249_v0  ;;  %v247_v2 = vld [vmem:[#allocation3 + $0x28] sm:$0xff]  ;;  %v246_v3 = vld [vmem:[#allocation3 + $0x20] sm:$0xff]  ;;  %v245_v4 = vld [vmem:[#allocation3 + $0x18] sm:$0xff] }
   0x7   :  { %v244_v5 = vld [vmem:[#allocation3 + $0x10] sm:$0xff]  ;;  %v243_v6 = vld [vmem:[#allocation3 + $0x8] sm:$0xff]  ;;  %v242_v7 = vld [vmem:[#allocation3] sm:$0xff] }
   0x8   :  { %v45_v8 = vld [vmem:[%s354_s0] sm:$0xff]  ;;  %v46_v9 = vld [vmem:[%s354_s0 + $0x8] sm:$0xff] }
   0x9   :  { %v47_v10 = vpack.c.bf16 %v46_v9, %v45_v8  ;;  %v253_v11 = vld [vmem:[%s356_s2] ss:$0 sm:$0xff]  ;;  %v144_v18 = vld [vmem:[%s357_s3 + $0x8] sm:$0xff] }
   0xa   :  { %115 = vmatpush.bf16.msra.mxu0 %v248_v1  ;;  %v143_v13 = vld [vmem:[%s357_s3] sm:$0xff] }
   0xb   :  { %v254_v45 = vld [vmem:[%s358_s4] ss:$0 sm:$0xff] }
   0xc   :  { %v255_v48 = vld [vmem:[%s359_s5] ss:$0 sm:$0xff] }
   0xe   :  { %116 = vmatpush.bf16.msra.mxu0 %v247_v2 }
  0x12   :  { %117 = vmatpush.bf16.msra.mxu0 %v246_v3 }
  0x16   :  { %118 = vmatpush.bf16.msra.mxu0 %v245_v4 }
  0x1a   :  { %119 = vmatpush.bf16.msra.mxu0 %v244_v5 }
  0x1e   :  { %120 = vmatpush.bf16.msra.mxu0 %v243_v6 }
  0x22   :  { %121 = vmatpush.bf16.msra.mxu0 %v242_v7 }
  0x25   :  { %122 = vmatmul.bf16.vlgmr.msra.gmra.mxu0 %v47_v10 }
  0xa2   :  { %v123_v12 = vpop.f32.mrf.mxu0 }
  0xa3   :  { %v141_v14 = vadd.f32 %v253_v11, %v123_v12 }
  0xa5   :  { %v145_v15 = vadd.f32 %v143_v13, %v141_v14 }
  0xa7   :  { %147 = vadd.xlane.f32.xlu0 %v145_v15  ;;  %v153_v16 = vmul.f32 %v145_v15, %v145_v15 }
  0xa9   :  { %155 = vadd.xlane.f32.xlu1 %v153_v16 }
  0xaa   :  { %v125_v17 = vpop.f32.mrf.mxu0 }
  0xab   :  { %v142_v19 = vadd.f32 %v253_v11, %v125_v17 }
  0xad   :  { %v146_v20 = vadd.f32 %v144_v18, %v142_v19 }
  0xaf   :  { %149 = vadd.xlane.f32.xlu0 %v146_v20  ;;  %v154_v21 = vmul.f32 %v146_v20, %v146_v20 }
  0xb1   :  { %157 = vadd.xlane.f32.xlu1 %v154_v21 }
 0x11a   :  { %v148_v22 = vpop.xlane.xlu0 %147 }
 0x11b   :  { %v151_v23 = vmul.f32 0.03125, %v148_v22 }
 0x11c   :  { %v156_v24 = vpop.xlane.xlu1 %155 }
 0x11d   :  { %v161_v25 = vmul.f32 %v151_v23, %v151_v23  ;;  %v159_v26 = vmul.f32 0.03125, %v156_v24  ;;  %v165_v44 = vsub.f32 %v145_v15, %v151_v23 }
 0x11f   :  { %v163_v27 = vsub.f32 %v159_v26, %v161_v25 }
 0x121   :  { %v167_v28 = vadd.f32 1e-06, %v163_v27 }
 0x122   :  { %v150_v29 = vpop.xlane.xlu0 %149 }
 0x123   :  { %256 = vrsqrt.f32 %v167_v28  ;;  %v152_v30 = vmul.f32 0.03125, %v150_v29  ;;  %vm175_vm1 = vweird.f32 %v167_v28 }
 0x124   :  { %v158_v31 = vpop.xlane.xlu1 %157 }
 0x125   :  { %v162_v32 = vmul.f32 %v152_v30, %v152_v30  ;;  %v160_v33 = vmul.f32 0.03125, %v158_v31  ;;  %v166_v55 = vsub.f32 %v146_v20, %v152_v30 }
 0x127   :  { %v164_v34 = vsub.f32 %v160_v33, %v162_v32 }
 0x129   :  { %v257_v35 = vpop.eup %256  ;;  %v168_v36 = vadd.f32 1e-06, %v164_v34 }
 0x12a   :  { %v170_v37 = vmul.f32 %v257_v35, %v167_v28  ;;  %vm176_vm0 = vweird.f32 %v257_v35 }
 0x12b   :  { %258 = vrsqrt.f32 %v168_v36  ;;  %vm177_vm2 = vmor %vm175_vm1, %vm176_vm0  ;;  %vm185_vm4 = vweird.f32 %v168_v36 }
 0x12c   :  { %v171_v38 = vmul.f32 %v257_v35, %v170_v37 }
 0x12e   :  { %v172_v39 = vmul.f32 0.5, %v171_v38 }
 0x130   :  { %v173_v40 = vsub.f32 1.5, %v172_v39 }
 0x131   :  { %v259_v41 = vpop.eup %258 }
 0x132   :  { %v174_v42 = vmul.f32 %v257_v35, %v173_v40  ;;  %v180_v43 = vmul.f32 %v259_v41, %v168_v36  ;;  %vm186_vm3 = vweird.f32 %v259_v41 }
 0x133   :  { %vm187_vm5 = vmor %vm185_vm4, %vm186_vm3 }
 0x134   :  { %v178_v46 = vsel %vm177_vm2, %v257_v35, %v174_v42  ;;  %v181_v47 = vmul.f32 %v259_v41, %v180_v43 }
 0x135   :  { %v189_v49 = vmul.f32 %v178_v46, %v165_v44 }
 0x136   :  { %v182_v50 = vmul.f32 0.5, %v181_v47 }
 0x137   :  { %v195_v51 = vmul.f32 %v254_v45, %v189_v49 }
 0x138   :  { %v183_v52 = vsub.f32 1.5, %v182_v50 }
 0x139   :  { %v201_v53 = vadd.f32 %v255_v48, %v195_v51 }
 0x13a   :  { %v184_v54 = vmul.f32 %v259_v41, %v183_v52 }
 0x13b   :  { %203 = vst [vmem:[%s360_s6] sm:$0xff] %v201_v53 }
 0x13c   :  { %v188_v56 = vsel %vm187_vm5, %v259_v41, %v184_v54 }
 0x13d   :  { %v190_v57 = vmul.f32 %v188_v56, %v166_v55 }
 0x13f   :  { %v196_v58 = vmul.f32 %v254_v45, %v190_v57 }
 0x141   :  { %v202_v59 = vadd.f32 %v255_v48, %v196_v58 }
 0x143   :  { %204 = vst [vmem:[%s360_s6 + $0x8] sm:$0xff] %v202_v59 }
 0x144   :  { %209 = vsyncpa [#allocation4], 1 }

// kernel: transformer_forward.56
= control target key start
LH: loop header
LB: loop body
LE: loop exit
PB: predicated region body
PF: predicated region fallthrough
CT: control target
= control target key end

     0   :  { %s382_s1 = inlined_call_operand.vmem [shape: bf16[128,256], index: 1, kind: input, shape index: {}]   ;;  %s383_s0 = inlined_call_operand.vmem [shape: f32[16,128], index: 0, kind: input, shape index: {}]   ;;  %s384_s2 = inlined_call_operand.vmem [shape: f32[16,256], index: 2, kind: output, shape index: {}]  }
   0x1   :  { %v231_v0 = vld [vmem:[%s382_s1 + $0x70] sm:$0xf]  ;;  %v252_v1 = vld [vmem:[%s382_s1 + $0x74] sm:$0xf0]  ;;  %v251_v2 = vld [vmem:[%s382_s1 + $0x74] sm:$0xf] }
   0x2   :  { %v232_v3 = vor.u32 %v252_v1, %v231_v0  ;;  %v233_v4 = vld [vmem:[%s382_s1 + $0x78] sm:$0xf0]  ;;  %v223_v5 = vld [vmem:[%s382_s1 + $0x60] sm:$0xf]  ;;  %v250_v6 = vld [vmem:[%s382_s1 + $0x64] sm:$0xf0] }
   0x3   :  { %v236_v7 = vor.u32 %v251_v2, %v233_v4  ;;  %v249_v8 = vld [vmem:[%s382_s1 + $0x64] sm:$0xf]  ;;  %v225_v9 = vld [vmem:[%s382_s1 + $0x68] sm:$0xf0]  ;;  %v224_v10 = vor.u32 %v250_v6, %v223_v5  ;;  %v215_v12 = vld [vmem:[%s382_s1 + $0x50] sm:$0xf] }
   0x4   :  { %122 = vmatpush.bf16.msra.mxu0 %v232_v3  ;;  %v228_v11 = vor.u32 %v249_v8, %v225_v9  ;;  %v248_v13 = vld [vmem:[%s382_s1 + $0x54] sm:$0xf0]  ;;  %v247_v14 = vld [vmem:[%s382_s1 + $0x54] sm:$0xf]  ;;  %v217_v15 = vld [vmem:[%s382_s1 + $0x58] sm:$0xf0] }
   0x5   :  { %136 = vmatpush.bf16.msra.mxu1 %v236_v7  ;;  %v216_v16 = vor.u32 %v248_v13, %v215_v12  ;;  %v220_v17 = vor.u32 %v247_v14, %v217_v15  ;;  %v207_v18 = vld [vmem:[%s382_s1 + $0x40] sm:$0xf]  ;;  %v246_v19 = vld [vmem:[%s382_s1 + $0x44] sm:$0xf0]  ;;  %v245_v20 = vld [vmem:[%s382_s1 + $0x44] sm:$0xf] }
   0x6   :  { %v209_v21 = vld [vmem:[%s382_s1 + $0x48] sm:$0xf0]  ;;  %v208_v22 = vor.u32 %v246_v19, %v207_v18  ;;  %v199_v24 = vld [vmem:[%s382_s1 + $0x30] sm:$0xf]  ;;  %v244_v25 = vld [vmem:[%s382_s1 + $0x34] sm:$0xf0] }
   0x7   :  { %v212_v23 = vor.u32 %v245_v20, %v209_v21  ;;  %v243_v26 = vld [vmem:[%s382_s1 + $0x34] sm:$0xf]  ;;  %v201_v27 = vld [vmem:[%s382_s1 + $0x38] sm:$0xf0]  ;;  %v200_v28 = vor.u32 %v244_v25, %v199_v24  ;;  %v191_v30 = vld [vmem:[%s382_s1 + $0x20] sm:$0xf] }
   0x8   :  { %123 = vmatpush.bf16.msra.mxu0 %v224_v10  ;;  %v204_v29 = vor.u32 %v243_v26, %v201_v27  ;;  %v242_v31 = vld [vmem:[%s382_s1 + $0x24] sm:$0xf0]  ;;  %v241_v32 = vld [vmem:[%s382_s1 + $0x24] sm:$0xf]  ;;  %v193_v33 = vld [vmem:[%s382_s1 + $0x28] sm:$0xf0] }
   0x9   :  { %137 = vmatpush.bf16.msra.mxu1 %v228_v11  ;;  %v192_v34 = vor.u32 %v242_v31, %v191_v30  ;;  %v196_v35 = vor.u32 %v241_v32, %v193_v33  ;;  %v183_v36 = vld [vmem:[%s382_s1 + $0x10] sm:$0xf]  ;;  %v240_v37 = vld [vmem:[%s382_s1 + $0x14] sm:$0xf0]  ;;  %v239_v38 = vld [vmem:[%s382_s1 + $0x14] sm:$0xf] }
   0xa   :  { %v185_v39 = vld [vmem:[%s382_s1 + $0x18] sm:$0xf0]  ;;  %v184_v40 = vor.u32 %v240_v37, %v183_v36  ;;  %v175_v42 = vld [vmem:[%s382_s1] sm:$0xf]  ;;  %v238_v43 = vld [vmem:[%s382_s1 + $0x4] sm:$0xf0] }
   0xb   :  { %v188_v41 = vor.u32 %v239_v38, %v185_v39  ;;  %v237_v44 = vld [vmem:[%s382_s1 + $0x4] sm:$0xf]  ;;  %v177_v45 = vld [vmem:[%s382_s1 + $0x8] sm:$0xf0]  ;;  %v176_v46 = vor.u32 %v238_v43, %v175_v42 }
   0xc   :  { %124 = vmatpush.bf16.msra.mxu0 %v216_v16  ;;  %v19_v47 = vld [vmem:[%s383_s0] sm:$0xff]  ;;  %v20_v48 = vld [vmem:[%s383_s0 + $0x8] sm:$0xff]  ;;  %v180_v49 = vor.u32 %v237_v44, %v177_v45 }
   0xd   :  { %138 = vmatpush.bf16.msra.mxu1 %v220_v17  ;;  %v21_v50 = vpack.c.bf16 %v20_v48, %v19_v47 }
  0x10   :  { %125 = vmatpush.bf16.msra.mxu0 %v208_v22 }
  0x11   :  { %139 = vmatpush.bf16.msra.mxu1 %v212_v23 }
  0x14   :  { %126 = vmatpush.bf16.msra.mxu0 %v200_v28 }
  0x15   :  { %140 = vmatpush.bf16.msra.mxu1 %v204_v29 }
  0x18   :  { %127 = vmatpush.bf16.msra.mxu0 %v192_v34 }
  0x19   :  { %141 = vmatpush.bf16.msra.mxu1 %v196_v35 }
  0x1c   :  { %128 = vmatpush.bf16.msra.mxu0 %v184_v40 }
  0x1d   :  { %142 = vmatpush.bf16.msra.mxu1 %v188_v41 }
  0x20   :  { %129 = vmatpush.bf16.msra.mxu0 %v176_v46 }
  0x21   :  { %143 = vmatpush.bf16.msra.mxu1 %v180_v49 }
  0x23   :  { %130 = vmatmul.bf16.vlgmr.msra.gmra.mxu0 %v21_v50 }
  0x24   :  { %144 = vmatmul.bf16.vlgmr.msra.gmra.mxu1 %v21_v50 }
  0xa0   :  { %v131_v51 = vpop.f32.mrf.mxu0 }
  0xa1   :  { %165 = vst [vmem:[%s384_s2] sm:$0xff] %v131_v51  ;;  %v145_v52 = vpop.f32.mrf.mxu1 }
  0xa2   :  { %166 = vst [vmem:[%s384_s2 + $0x8] sm:$0xff] %v145_v52 }
  0xa8   :  { %v133_v53 = vpop.f32.mrf.mxu0 }
  0xa9   :  { %167 = vst [vmem:[%s384_s2 + $0x10] sm:$0xff] %v133_v53  ;;  %v147_v54 = vpop.f32.mrf.mxu1 }
  0xaa   :  { %168 = vst [vmem:[%s384_s2 + $0x18] sm:$0xff] %v147_v54 }

// kernel: transformer_forward.47
= control target key start
LH: loop header
LB: loop body
LE: loop exit
PB: predicated region body
PF: predicated region fallthrough
CT: control target
= control target key end

     0   :  { %7 = vsyncpa [#allocation4], 0  ;;  %s299_s12 = smov [#allocation3]   ;;  %s300_s14 = smov 128   ;;  %s338_s0 = inlined_call_operand.vmem [shape: f32[16,128], index: 0, kind: input, shape index: {}]   ;;  %s339_s1 = inlined_call_operand.hbm [shape: bf16[128,256], index: 1, kind: input, shape index: {}]   ;;  %s340_s2 = inlined_call_operand.vmem [shape: f32[16,256], index: 2, kind: output, shape index: {}]  }
   0x1   :  { %s14_s11 = sshll.u32 %s339_s1, 4  ;;  %s16_s13 = sshll.u32 %s299_s12, 4  ;;  %s15_s11 = int_to_ptr.hbm [resolvable:$true] %s14_s11  ;;  %s17_s13 = int_to_ptr.vmem [resolvable:$true] %s16_s13 }
   0x2   :  { %s301_s15 = smov 8  }
   0x3   :  { %22 = dma.hbm_to_vmem [thread:$0]  %s15_s11, 2048, %s17_s13, [#allocation4], %s300_s14, %s300_s14, %s301_s15  }
   0x4   :  { %297 = dma.done.wait [#allocation4], 2048  }
   0x5   :  { %298 = vsyncadd [#allocation4], 4294965248  ;;  %v248_v0 = vld [vmem:[#allocation3 + $0x70] sm:$0xf]  ;;  %v269_v1 = vld [vmem:[#allocation3 + $0x74] sm:$0xf0] }
   0x6   :  { %v268_v2 = vld [vmem:[#allocation3 + $0x74] sm:$0xf]  ;;  %v249_v3 = vor.u32 %v269_v1, %v248_v0  ;;  %v250_v4 = vld [vmem:[#allocation3 + $0x78] sm:$0xf0]  ;;  %v240_v5 = vld [vmem:[#allocation3 + $0x60] sm:$0xf] }
   0x7   :  { %v267_v6 = vld [vmem:[#allocation3 + $0x64] sm:$0xf0]  ;;  %v253_v7 = vor.u32 %v268_v2, %v250_v4  ;;  %v266_v8 = vld [vmem:[#allocation3 + $0x64] sm:$0xf]  ;;  %v242_v9 = vld [vmem:[#allocation3 + $0x68] sm:$0xf0] }
   0x8   :  { %138 = vmatpush.bf16.msra.mxu0 %v249_v3  ;;  %v241_v10 = vor.u32 %v267_v6, %v240_v5  ;;  %v245_v11 = vor.u32 %v266_v8, %v242_v9  ;;  %v232_v12 = vld [vmem:[#allocation3 + $0x50] sm:$0xf]  ;;  %v265_v13 = vld [vmem:[#allocation3 + $0x54] sm:$0xf0]  ;;  %v264_v14 = vld [vmem:[#allocation3 + $0x54] sm:$0xf] }
   0x9   :  { %152 = vmatpush.bf16.msra.mxu1 %v253_v7  ;;  %v234_v15 = vld [vmem:[#allocation3 + $0x58] sm:$0xf0]  ;;  %v233_v16 = vor.u32 %v265_v13, %v232_v12  ;;  %v224_v18 = vld [vmem:[#allocation3 + $0x40] sm:$0xf]  ;;  %v263_v19 = vld [vmem:[#allocation3 + $0x44] sm:$0xf0] }
   0xa   :  { %v237_v17 = vor.u32 %v264_v14, %v234_v15  ;;  %v262_v20 = vld [vmem:[#allocation3 + $0x44] sm:$0xf]  ;;  %v226_v21 = vld [vmem:[#allocation3 + $0x48] sm:$0xf0]  ;;  %v225_v22 = vor.u32 %v263_v19, %v224_v18  ;;  %v216_v24 = vld [vmem:[#allocation3 + $0x30] sm:$0xf] }
   0xb   :  { %v229_v23 = vor.u32 %v262_v20, %v226_v21  ;;  %v261_v25 = vld [vmem:[#allocation3 + $0x34] sm:$0xf0]  ;;  %v260_v26 = vld [vmem:[#allocation3 + $0x34] sm:$0xf]  ;;  %v218_v27 = vld [vmem:[#allocation3 + $0x38] sm:$0xf0] }
   0xc   :  { %139 = vmatpush.bf16.msra.mxu0 %v241_v10  ;;  %v217_v28 = vor.u32 %v261_v25, %v216_v24  ;;  %v221_v29 = vor.u32 %v260_v26, %v218_v27  ;;  %v208_v30 = vld [vmem:[#allocation3 + $0x20] sm:$0xf]  ;;  %v259_v31 = vld [vmem:[#allocation3 + $0x24] sm:$0xf0]  ;;  %v258_v32 = vld [vmem:[#allocation3 + $0x24] sm:$0xf] }
   0xd   :  { %153 = vmatpush.bf16.msra.mxu1 %v245_v11  ;;  %v210_v33 = vld [vmem:[#allocation3 + $0x28] sm:$0xf0]  ;;  %v209_v34 = vor.u32 %v259_v31, %v208_v30  ;;  %v200_v36 = vld [vmem:[#allocation3 + $0x10] sm:$0xf]  ;;  %v257_v37 = vld [vmem:[#allocation3 + $0x14] sm:$0xf0] }
   0xe   :  { %v213_v35 = vor.u32 %v258_v32, %v210_v33  ;;  %v256_v38 = vld [vmem:[#allocation3 + $0x14] sm:$0xf]  ;;  %v202_v39 = vld [vmem:[#allocation3 + $0x18] sm:$0xf0]  ;;  %v201_v40 = vor.u32 %v257_v37, %v200_v36  ;;  %v192_v42 = vld [vmem:[#allocation3] sm:$0xf] }
   0xf   :  { %v205_v41 = vor.u32 %v256_v38, %v202_v39  ;;  %v255_v43 = vld [vmem:[#allocation3 + $0x4] sm:$0xf0]  ;;  %v254_v44 = vld [vmem:[#allocation3 + $0x4] sm:$0xf]  ;;  %v194_v45 = vld [vmem:[#allocation3 + $0x8] sm:$0xf0] }
  0x10   :  { %140 = vmatpush.bf16.msra.mxu0 %v233_v16  ;;  %v193_v46 = vor.u32 %v255_v43, %v192_v42  ;;  %v35_v47 = vld [vmem:[%s338_s0] sm:$0xff]  ;;  %v36_v48 = vld [vmem:[%s338_s0 + $0x8] sm:$0xff]  ;;  %v197_v49 = vor.u32 %v254_v44, %v194_v45 }
  0x11   :  { %154 = vmatpush.bf16.msra.mxu1 %v237_v17  ;;  %v37_v50 = vpack.c.bf16 %v36_v48, %v35_v47 }
  0x14   :  { %141 = vmatpush.bf16.msra.mxu0 %v225_v22 }
  0x15   :  { %155 = vmatpush.bf16.msra.mxu1 %v229_v23 }
  0x18   :  { %142 = vmatpush.bf16.msra.mxu0 %v217_v28 }
  0x19   :  { %156 = vmatpush.bf16.msra.mxu1 %v221_v29 }
  0x1c   :  { %143 = vmatpush.bf16.msra.mxu0 %v209_v34 }
  0x1d   :  { %157 = vmatpush.bf16.msra.mxu1 %v213_v35 }
  0x20   :  { %144 = vmatpush.bf16.msra.mxu0 %v201_v40 }
  0x21   :  { %158 = vmatpush.bf16.msra.mxu1 %v205_v41 }
  0x24   :  { %145 = vmatpush.bf16.msra.mxu0 %v193_v46 }
  0x25   :  { %159 = vmatpush.bf16.msra.mxu1 %v197_v49 }
  0x27   :  { %146 = vmatmul.bf16.vlgmr.msra.gmra.mxu0 %v37_v50 }
  0x28   :  { %160 = vmatmul.bf16.vlgmr.msra.gmra.mxu1 %v37_v50 }
  0xa4   :  { %v147_v51 = vpop.f32.mrf.mxu0 }
  0xa5   :  { %181 = vst [vmem:[%s340_s2] sm:$0xff] %v147_v51  ;;  %v161_v52 = vpop.f32.mrf.mxu1 }
  0xa6   :  { %182 = vst [vmem:[%s340_s2 + $0x8] sm:$0xff] %v161_v52 }
  0xac   :  { %v149_v53 = vpop.f32.mrf.mxu0 }
  0xad   :  { %183 = vst [vmem:[%s340_s2 + $0x10] sm:$0xff] %v149_v53  ;;  %v163_v54 = vpop.f32.mrf.mxu1 }
  0xae   :  { %184 = vst [vmem:[%s340_s2 + $0x18] sm:$0xff] %v163_v54 }
  0xaf   :  { %189 = vsyncpa [#allocation4], 1 }

// kernel: transformer_forward.61
= control target key start
LH: loop header
LB: loop body
LE: loop exit
PB: predicated region body
PF: predicated region fallthrough
CT: control target
= control target key end

     0   :  { %s194_s0 = inlined_call_operand.vmem [shape: f32[16,128], index: 0, kind: input, shape index: {}]   ;;  %s195_s1 = inlined_call_operand.vmem [shape: f32[128,128], index: 1, kind: input, shape index: {}]   ;;  %s196_s2 = inlined_call_operand.hbm [shape: f32[16,128], index: 2, kind: output, shape index: {}]  }
   0x1   :  { %v35_v0 = vld [vmem:[%s195_s1 + $0x70] sm:$0xff]  ;;  %v36_v1 = vld [vmem:[%s195_s1 + $0x78] sm:$0xff]  ;;  %v33_v3 = vld [vmem:[%s195_s1 + $0x60] sm:$0xff] }
   0x2   :  { %v44_v2 = vpack.c.bf16 %v36_v1, %v35_v0  ;;  %v34_v4 = vld [vmem:[%s195_s1 + $0x68] sm:$0xff] }
   0x4   :  { %47 = vmatpush.bf16.xpose.msra.mxu0 %v44_v2 }
   0x5   :  { %7 = vsyncpa [#allocation4], 0  ;;  %v43_v5 = vpack.c.bf16 %v34_v4, %v33_v3  ;;  %v31_v6 = vld [vmem:[%s195_s1 + $0x50] sm:$0xff]  ;;  %v32_v7 = vld [vmem:[%s195_s1 + $0x58] sm:$0xff]  ;;  %s119_s17 = smov [#allocation3]   ;;  %s120_s21 = smov 128  }
   0x6   :  { %v42_v8 = vpack.c.bf16 %v32_v7, %v31_v6  ;;  %v29_v9 = vld [vmem:[%s195_s1 + $0x40] sm:$0xff]  ;;  %v30_v10 = vld [vmem:[%s195_s1 + $0x48] sm:$0xff]  ;;  %v27_v12 = vld [vmem:[%s195_s1 + $0x30] sm:$0xff]  ;;  %s76_s18 = sshll.u32 %s119_s17, 4  ;;  %s121_s22 = smov 8   ;;  %s77_s18 = int_to_ptr.vmem [resolvable:$true] %s76_s18 }
   0x7   :  { %v41_v11 = vpack.c.bf16 %v30_v10, %v29_v9  ;;  %v28_v13 = vld [vmem:[%s195_s1 + $0x38] sm:$0xff]  ;;  %v25_v15 = vld [vmem:[%s195_s1 + $0x20] sm:$0xff]  ;;  %v26_v16 = vld [vmem:[%s195_s1 + $0x28] sm:$0xff] }
   0x8   :  { %v40_v14 = vpack.c.bf16 %v28_v13, %v27_v12  ;;  %v39_v17 = vpack.c.bf16 %v26_v16, %v25_v15  ;;  %v23_v18 = vld [vmem:[%s195_s1 + $0x10] sm:$0xff]  ;;  %v24_v19 = vld [vmem:[%s195_s1 + $0x18] sm:$0xff]  ;;  %v21_v21 = vld [vmem:[%s195_s1] sm:$0xff] }
   0x9   :  { %v38_v20 = vpack.c.bf16 %v24_v19, %v23_v18  ;;  %v22_v22 = vld [vmem:[%s195_s1 + $0x8] sm:$0xff]  ;;  %v18_v24 = vld [vmem:[%s194_s0] sm:$0xff]  ;;  %s78_s1 = sshll.u32 %s196_s2, 4  ;;  %s79_s1 = int_to_ptr.hbm [resolvable:$true] %s78_s1 }
   0xa   :  { %v37_v23 = vpack.c.bf16 %v22_v22, %v21_v21  ;;  %v19_v25 = vld [vmem:[%s194_s0 + $0x8] sm:$0xff] }
   0xb   :  { %v20_v26 = vpack.c.bf16 %v19_v25, %v18_v24 }
   0xc   :  { %48 = vmatpush.bf16.xpose.msra.mxu0 %v43_v5 }
  0x14   :  { %49 = vmatpush.bf16.xpose.msra.mxu0 %v42_v8 }
  0x1c   :  { %50 = vmatpush.bf16.xpose.msra.mxu0 %v41_v11 }
  0x24   :  { %51 = vmatpush.bf16.xpose.msra.mxu0 %v40_v14 }
  0x2c   :  { %52 = vmatpush.bf16.xpose.msra.mxu0 %v39_v17 }
  0x34   :  { %53 = vmatpush.bf16.xpose.msra.mxu0 %v38_v20 }
  0x3c   :  { %54 = vmatpush.bf16.xpose.msra.mxu0 %v37_v23 }
  0x43   :  { %55 = vmatmul.bf16.vlgmr.msra.gmra.mxu0 %v20_v26 }
  0xc0   :  { %v56_v27 = vpop.f32.mrf.mxu0 }
  0xc1   :  { %70 = vst [vmem:[#allocation3] sm:$0xff] %v56_v27 }
  0xc8   :  { %v58_v28 = vpop.f32.mrf.mxu0 }
  0xc9   :  { %71 = vst [vmem:[#allocation3 + $0x8] sm:$0xff] %v58_v28 }
  0xca   :  { %84 = dma.vmem_to_hbm [thread:$0]  %s77_s18, 256, %s79_s1, [#allocation4], %s120_s21, %s120_s21, %s121_s22  }
  0xcb   :  { %117 = dma.done.wait [#allocation4], 256  }
  0xcc   :  { %118 = vsyncadd [#allocation4], 4294967040 }
  0xcd   :  { %89 = vsyncpa [#allocation4], 1 }

// kernel: transformer_forward.48
= control target key start
LH: loop header
LB: loop body
LE: loop exit
PB: predicated region body
PF: predicated region fallthrough
CT: control target
= control target key end

     0   :  { %s568_s15 = smov 0   ;;  %s622_s0 = inlined_call_operand.vmem [shape: f32[2,8,128], index: 0, kind: input, shape index: {}]   ;;  %s623_s1 = inlined_call_operand.vmem [shape: f32[2,8,256], index: 1, kind: input, shape index: {}, may-alias: {1,2}]   ;;  %s624_s2 = inlined_call_operand.vmem [shape: f32[2,8,256], index: 2, kind: input, shape index: {}, may-alias: {1,2}]   ;;  %s625_s3 = inlined_call_operand.vmem [shape: s32[2,8,8], index: 3, kind: input, shape index: {}]   ;;  %s626_s4 = inlined_call_operand.vmem [shape: f32[2,8,128], index: 4, kind: output, shape index: {}]  }
   0x1 LB: > { %s492_s16 = sadd.s32 4294967295, %s539_s15   ;;  %p496_p0 = scmp.ge.s32.totalorder %s539_s15, 1  ;;  %s539_s15 = sphi %s568_s15, %s14_s15  }
   0x2   : > { %p191_p1 = scmp.lt.s32.totalorder %s539_s15, 3 }
   0x4   : > { %p192_p2 = pnand %p496_p0, %p191_p1 }
   0x5   : > { %p230_p3 = scmp.lt.s32.totalorder (!%p192_p2), %s492_s16, 1  ;;  %s541_s22 = smov (!%p192_p2), 64  }
   0x6   : > { %195 = sbr.rel (%p192_p2) target bundleno = 777 (0x309), region = 36 }
   0xb   : > { %s628_s16 = smov (!%p230_p3, %s492_s16), 1  ;;  %vm259_vm0 = vcmask 523264   ;;  %v542_v6 = vmov -1e+09   ;;  %vm288_vm2 = vcmask 64512  }
   0xc   : > { %s513_s17 = sshll.u32 %s628_s16, 4  ;;  %s585_s21 = sshll.u32 %s628_s16, 3 }
   0xd   : > { %s238_s20 = scalar_lea.vmem %s623_s1, %s513_s17  ;;  %s233_s25 = scalar_lea.vmem %s622_s0, %s585_s21 }
   0xe   : > { %v257_v0 = vld [vmem:[%s238_s20] sm:$0xff]  ;;  %s248_s28 = scalar_lea.vmem %s625_s3, %s585_s21  ;;  %s444_s5 = scalar_lea.vmem %s624_s2, %s513_s17 }
   0xf   : > { %325 = vrot.lane.b32.xlu0 %v257_v0, %s541_s22  ;;  %v256_v1 = vld [vmem:[%s233_s25] sm:$0xff]  ;;  %505 = vmatpush.xpose.msk.msra.mxu0 %vm259_vm0, %v257_v0  ;;  %v504_v15 = vld [vmem:[%s444_s5 + $0x8] sm:$0xff]  ;;  %s252_s8 = scalar_lea.vmem %s626_s4, %s585_s21 }
  0x10   : > { %v253_v4 = vld [vmem:[%s248_s28] sm:$0xff]  ;;  %318 = vmatpush.msra.mxu1 %v504_v15 }
  0x11   : > { %vm254_vm1 = vcmp.gt.s32.totalorder %v253_v4, 0 }
  0x12   : > { %506 = vmatmul.msk.f32.vlgmr.msra.gmra.mxu0 %vm259_vm0, %v256_v1  ;;  %v255_v7 = vsel %vm254_vm1, 0.0, %v542_v6 }
  0x17   : > { %323 = vrot.lane.b32.xlu0 %v256_v1, %s541_s22 }
  0x81   : > { %v326_v2 = vpop.permute.xlu0 %325 }
  0x82   : > { %508 = vmatpush.xpose.msk.msra.mxu2 %vm259_vm0, %v326_v2 }
  0x89   : > { %v324_v3 = vpop.permute.xlu0 %323 }
  0x8a   : > { %509 = vmatmul.msk.f32.vlgmr.msra.gmra.mxu2 %vm259_vm0, %v324_v3 }
  0x8f   : > { %v283_v8 = vpop.f32.mrf.mxu0 }
  0x90   : > { %v286_v11 = vmul.f32 0.25, %v283_v8 }
  0x92   : > { %v287_v13 = vadd.f32 %v286_v11, %v255_v7 }
  0x94   : > { %v289_v14 = vsel %vm288_vm2, %v287_v13, -inf }
 0x10d   : > { %v348_v5 = vpop.f32.mrf.mxu2 }
 0x10e   : > { %v351_v9 = vmul.f32 0.25, %v348_v5 }
 0x110   : > { %v352_v10 = vadd.f32 %v351_v9, %v255_v7 }
 0x112   : > { %v353_v12 = vsel %vm288_vm2, %v352_v10, -inf }
 0x113   : > { %354 = vmax.xlane.f32.xlu1 %v353_v12 }
 0x11b   : > { %290 = vmax.xlane.f32.xlu1 %v289_v14 }
 0x186   : > { %v355_v16 = vpop.xlane.xlu1 %354 }
 0x187   : > { %v356_v17 = vsub.f32 %v352_v10, %v355_v16 }
 0x189   : > { %v357_v18 = vmul.f32 1.442695, %v356_v17 }
 0x18b   : > { %525 = vpow2.f32 %v357_v18 }
 0x18e   : > { %v291_v19 = vpop.xlane.xlu1 %290 }
 0x18f   : > { %v292_v20 = vsub.f32 %v287_v13, %v291_v19 }
 0x191   : > { %v526_v21 = vpop.eup %525  ;;  %v293_v22 = vmul.f32 1.442695, %v292_v20 }
 0x192   : > { %v359_v23 = vsel %vm288_vm2, %v526_v21, 0.0 }
 0x193   : > { %527 = vpow2.f32 %v293_v22  ;;  %360 = vadd.xlane.f32.xlu2 %v359_v23 }
 0x199   : > { %v528_v24 = vpop.eup %527 }
 0x19a   : > { %v295_v25 = vsel %vm288_vm2, %v528_v24, 0.0 }
 0x19b   : > { %296 = vadd.xlane.f32.xlu0 %v295_v25 }
 0x1ab   : > { %365 = vrot.lane.b32.xlu2 %v504_v15, %s541_s22 }
 0x206   : > { %v361_v26 = vpop.xlane.xlu2 %360 }
 0x207   : > { %529 = vrcp.f32 %v361_v26 }
 0x20d   : > { %v530_v27 = vpop.eup %529 }
 0x20e   : > { %v366_v28 = vpop.permute.xlu2 %365  ;;  %v297_v29 = vpop.xlane.xlu0 %296  ;;  %v363_v30 = vmul.f32 %v530_v27, %v526_v21 }
 0x20f   : > { %531 = vrcp.f32 %v297_v29  ;;  %386 = vmatpush.msra.mxu3 %v366_v28 }
 0x210   : > { %510 = vmatmul.msk.f32.vlgmr.msra.gmra.mxu3 %vm288_vm2, %v363_v30 }
 0x215   : > { %v532_v31 = vpop.eup %531 }
 0x216   : > { %v299_v32 = vmul.f32 %v532_v31, %v528_v24 }
 0x218   : > { %507 = vmatmul.msk.f32.vlgmr.msra.gmra.mxu1 %vm288_vm2, %v299_v32 }
 0x293   : > { %v388_v33 = vpop.f32.mrf.mxu3 }
 0x294   : > { %392 = vrot.lane.b32.xlu1 %v388_v33, %s541_s22 }
 0x295   : > { %v320_v34 = vpop.f32.mrf.mxu1 }
 0x306   : > { %v393_v35 = vpop.permute.xlu1 %392 }
 0x307   : > { %v395_v36 = vsel %vm259_vm0, %v320_v34, %v393_v35 }
 0x308   : > { %396 = vst [vmem:[%s252_s8] sm:$0xff] %v395_v36 }
 0x309 PF: > { %s14_s15 = sadd.s32 1, %s539_s15  }
 0x30a   : > { %p11_p4 = scmp.ge.s32.totalorder %s14_s15, 4  }
 0x30c   :  { %13 = sbr.rel (!%p11_p4) target bundleno = 1 (0x1), region = 75 }

</bundles_post_ra>
